<compile_context>
chip_gen: v7x
topology: tpu7x:2x2x1
jax: 0.10.0
libtpu: 0.0.40
codegen_flags: <defaults>
</compile_context>

<pallas_src>
import math

import jax
import jax.numpy as jnp
from jax import lax
from jax.experimental import pallas as pl
from jax.experimental.pallas import tpu as pltpu

# ---------------- config (mirrors MultiheadDiffAttn __init__) ----------------
N_EMBD = 64          # config.n_embd
N_HEAD = 4           # config.n_head
N_KV_HEAD = 2        # config.n_kv_head (GQA)
SEQ = 16
BATCH = 2
DEPTH = 3

HEAD_DIM = N_EMBD // N_HEAD // 2           # 8
N_REP = N_HEAD // N_KV_HEAD                # 2
SCALE = HEAD_DIM ** -0.5                   # flash_attn default softmax scale
LAMBDA_INIT = 0.8 - 0.6 * math.exp(-0.3 * DEPTH)
RMS_EPS = 1e-5

HD2 = 2 * HEAD_DIM                         # per-head feature width (16)
QW = N_HEAD * HD2                          # q (or k) region width      (64)
ROTW = 2 * QW                              # rotary region width        (128)
W_BIG = 2 * ROTW + 2 * QW                  # fused qkv weight width     (384)


# ------------------------------ Pallas kernel ---------------------------------
def _fused_diff_attn_kernel(x_ref, w_ref, rope_ref, bias_ref, wo_ref, o_ref):
    # x_ref   : VMEM (BT, E)       bf16 activations, batch folded into rows
    # w_ref   : VMEM (E, 384)      bf16 [plain_rot(128)|swapped_rot(128)|V(64)|-lam*V(64)]
    # rope_ref: VMEM (2, BT, 128)  f32 row0 = tiled [cos|cos], row1 = [sin|-sin]
    # bias_ref: VMEM (BT, 2*BT)    f32 block-diag-causal additive bias (x2 tiled)
    # wo_ref  : VMEM (64, E)       bf16 out proj with RMSNorm gain*(1-lambda_init) folded in
    # o_ref   : VMEM (BT, E)
    BT = x_ref.shape[0]
    H, D = N_HEAD, HEAD_DIM

    # (1) single lane-dense projection matmul for every head / branch.
    proj = jnp.dot(x_ref[...], w_ref[...],
                   preferred_element_type=jnp.float32)           # (BT, 384) f32

    # (2) rotary: two full-width FMAs (cos/sin pre-tiled per group host-side).
    rot = (proj[:, :ROTW] * rope_ref[0]
           + proj[:, ROTW:2 * ROTW] * rope_ref[1])               # (BT, 128)
    v_pos = proj[:, 2 * ROTW:2 * ROTW + QW]                      # (BT, 64)  V per head
    v_neg = proj[:, 2 * ROTW + QW:]                              # (BT, 64)  -lam*V per head

    bias = bias_ref[...]                                         # (BT, 2*BT)

    # lane masks selecting k1 / k2 inside a head's 16-wide [k1|k2] group
    lane = lax.broadcasted_iota(jnp.int32, (1, HD2), 1)
    m1 = (lane < D).astype(jnp.float32)
    m2 = 1.0 - m1

    head_outs = []
    for h in range(H):                      # static 4-iteration loop (unrolled)
        qp = rot[:, h * HD2:(h + 1) * HD2]                       # (BT,16) = [q1|q2] (scaled)
        k12 = rot[:, QW + h * HD2:QW + (h + 1) * HD2]            # (BT,16) = [k1|k2]
        # branch-packed keys: rows [0,BT)=[k1|0], rows [BT,2BT)=[0|k2]
        kp = jnp.concatenate([k12 * m1, k12 * m2], axis=0)       # (2BT,16)
        s = lax.dot_general(qp.astype(jnp.bfloat16), kp.astype(jnp.bfloat16),
                            (((1,), (1,)), ((), ())),
                            preferred_element_type=jnp.float32)  # (BT, 2BT)
        s = s + bias
        # segmented softmax over the two BT-wide branch halves (f32)
        s1, s2 = s[:, :BT], s[:, BT:]
        p1 = jnp.exp(s1 - jnp.max(s1, axis=-1, keepdims=True))
        p2 = jnp.exp(s2 - jnp.max(s2, axis=-1, keepdims=True))
        p1 = p1 * pl.reciprocal(jnp.sum(p1, axis=-1, keepdims=True), approx=True)
        p2 = p2 * pl.reciprocal(jnp.sum(p2, axis=-1, keepdims=True), approx=True)
        p = jnp.concatenate([p1, p2], axis=1).astype(jnp.bfloat16)   # (BT, 2BT)
        # fused PV: [P1|P2] @ [[V],[-lam*V]] = attn1 - lambda_full * attn2
        vstack = jnp.concatenate([v_pos[:, h * HD2:(h + 1) * HD2],
                                  v_neg[:, h * HD2:(h + 1) * HD2]],
                                 axis=0).astype(jnp.bfloat16)        # (2BT, 16)
        o = jnp.dot(p, vstack, preferred_element_type=jnp.float32)   # (BT, 16)
        # per-head RMSNorm over 2*D features (gain folded into wo_eff)
        ms = jnp.mean(o * o, axis=-1, keepdims=True)
        head_outs.append(o * lax.rsqrt(ms + RMS_EPS))

    o_all = jnp.concatenate(head_outs, axis=1).astype(jnp.bfloat16)   # (BT, 64)
    # (3) fused output projection: the head-sum lives in the contraction.
    out = jnp.dot(o_all, wo_ref[...], preferred_element_type=jnp.float32)
    o_ref[...] = out.astype(o_ref.dtype)


def multihead_diff_attn(x, fused):
    """Fused Pallas forward of MultiheadDiffAttn. `fused` from prepare_fused_params."""
    B, T, E = x.shape
    BT = B * T
    x2d = x.reshape(BT, E).astype(jnp.bfloat16)
    # Single grid step: batch is folded into the sublane axis (best for single-TC
    # v5e/v6e; on v7x one would split batch/heads across a parallel grid axis).
    out2d = pl.pallas_call(
        _fused_diff_attn_kernel,
        out_shape=jax.ShapeDtypeStruct((BT, E), x.dtype),
        grid_spec=pltpu.PrefetchScalarGridSpec(
            num_scalar_prefetch=0,
            grid=(1,),
            in_specs=[
                pl.BlockSpec((BT, E), lambda i: (0, 0)),            # x (bf16)
                pl.BlockSpec((E, W_BIG), lambda i: (0, 0)),         # fused qkv W
                pl.BlockSpec((2, BT, ROTW), lambda i: (0, 0, 0)),   # rope tables
                pl.BlockSpec((BT, 2 * BT), lambda i: (0, 0)),       # causal bias
                pl.BlockSpec((QW, E), lambda i: (0, 0)),            # fused out W
            ],
            out_specs=pl.BlockSpec((BT, E), lambda i: (0, 0)),
        ),
        compiler_params=pltpu.CompilerParams(
            dimension_semantics=("arbitrary",)),
    )(x2d, fused["w_big"], fused["rope"], fused["bias"], fused["wo_eff"])
    return out2d.reshape(B, T, E)


# ------------------------- one-time parameter repack ---------------------------
def rotary_cos_sin(seq_len, dim, base=10000.0):
    inv_freq = 1.0 / (base ** (jnp.arange(0, dim, 2, dtype=jnp.float32) / dim))
    t = jnp.arange(seq_len, dtype=jnp.float32)
    freqs = jnp.outer(t, inv_freq)
    return jnp.cos(freqs), jnp.sin(freqs)          # (T, dim // 2)


def _lambda_full(params):
    lam1 = jnp.exp(jnp.sum(params["lambda_q1"] * params["lambda_k1"]))
    lam2 = jnp.exp(jnp.sum(params["lambda_q2"] * params["lambda_k2"]))
    return lam1 - lam2 + LAMBDA_INIT


def prepare_fused_params(params, seq_len, batch):
    """Repack PyTorch-style params into the fused kernel layout (done once)."""
    H, KV, D, E = N_HEAD, N_KV_HEAD, HEAD_DIM, N_EMBD
    T, BT = seq_len, batch * seq_len

    def swap_half(w):  # swap the two rotary halves of each D-wide column group
        return jnp.concatenate([w[..., D // 2:], w[..., :D // 2]], axis=-1)

    wq = params["wq"].reshape(E, H, 2, D) * SCALE      # softmax scale folded into q
    wk = params["wk"].reshape(E, KV, 2, D)
    wv = params["wv"].reshape(E, KV, 2 * D)

    kv_idx = jnp.arange(H) // N_REP                    # GQA: q head h -> kv head h//n_rep
    wkr = jnp.take(wk, kv_idx, axis=1)                 # (E, H, 2, D)
    wvr = jnp.take(wv, kv_idx, axis=1)                 # (E, H, 2D)

    plain = jnp.concatenate([wq.reshape(E, H * 2 * D),
                             wkr.reshape(E, H * 2 * D)], axis=-1)            # (E,128)
    swapped = jnp.concatenate([swap_half(wq).reshape(E, H * 2 * D),
                               swap_half(wkr).reshape(E, H * 2 * D)], axis=-1)
    lam = _lambda_full(params)
    v_pos = wvr.reshape(E, H * 2 * D)                                        # (E,64)
    w_big = jnp.concatenate([plain, swapped, v_pos, -lam * v_pos],
                            axis=-1).astype(jnp.bfloat16)                    # (E,384)

    g = jnp.tile(params["subln_w"], (H,)) * (1.0 - LAMBDA_INIT)              # (64,)
    wo_eff = (params["wo"] * g[:, None]).astype(jnp.bfloat16)                # (64,64)

    cos, sin = rotary_cos_sin(T, D)                                          # (T, 4)
    cosd = jnp.concatenate([cos, cos], axis=-1)                              # (T, 8)
    sind = jnp.concatenate([sin, -sin], axis=-1)
    n_grp = ROTW // D                                                        # 16 D-groups
    rope = jnp.stack([jnp.tile(cosd, (batch, n_grp)),
                      jnp.tile(sind, (batch, n_grp))],
                     axis=0).astype(jnp.float32)                             # (2, BT, 128)

    rows = jnp.arange(BT)
    ok = (((rows[:, None] // T) == (rows[None, :] // T))
          & ((rows[:, None] % T) >= (rows[None, :] % T)))
    bias = jnp.tile(jnp.where(ok, 0.0, -1e30).astype(jnp.float32), (1, 2))   # (BT, 2BT)

    return {"w_big": w_big, "wo_eff": wo_eff, "rope": rope, "bias": bias}


# --------------------------- pure-JAX reference --------------------------------
def apply_rotary_emb(x, cos, sin):
    # x: (B, T, A, D)
    d = x.shape[-1] // 2
    x1 = x[..., :d].astype(jnp.float32)
    x2 = x[..., d:].astype(jnp.float32)
    c = cos[None, :, None, :]
    s = sin[None, :, None, :]
    y1 = x1 * c + x2 * s
    y2 = -x1 * s + x2 * c
    return jnp.concatenate([y1, y2], axis=-1).astype(x.dtype)


def reference_forward(x, params):
    """Pure-JAX reference mirroring the PyTorch forward, for correctness check."""
    B, T, E = x.shape
    H, KV, D = N_HEAD, N_KV_HEAD, HEAD_DIM
    xf = x.reshape(B * T, E)
    q = (xf @ params["wq"]).reshape(B, T, 2 * H, D)
    k = (xf @ params["wk"]).reshape(B, T, 2 * KV, D)
    v = (xf @ params["wv"]).reshape(B, T, KV, 2, D)

    cos, sin = rotary_cos_sin(T, D)
    q = apply_rotary_emb(q, cos, sin)
    k = apply_rotary_emb(k, cos, sin)

    q = q.reshape(B, T, H, 2, D)
    k = k.reshape(B, T, KV, 2, D)
    q1, q2 = q[..., 0, :], q[..., 1, :]
    k1, k2 = k[..., 0, :], k[..., 1, :]
    v1, v2 = v[..., 0, :], v[..., 1, :]
    k1 = jnp.repeat(k1, N_REP, axis=2)
    k2 = jnp.repeat(k2, N_REP, axis=2)
    v1 = jnp.repeat(v1, N_REP, axis=2)
    v2 = jnp.repeat(v2, N_REP, axis=2)

    mask = jnp.tril(jnp.ones((T, T), dtype=bool))

    def attn(qh, kh, vh):
        s = jnp.einsum("bthd,bshd->bhts", qh, kh,
                       precision=lax.Precision.HIGHEST) * SCALE
        s = jnp.where(mask[None, None], s, -jnp.inf)
        p = jax.nn.softmax(s, axis=-1)
        return jnp.einsum("bhts,bshd->bthd", p, vh,
                          precision=lax.Precision.HIGHEST)

    a1 = jnp.concatenate([attn(q1, k1, v1), attn(q1, k1, v2)], axis=-1)
    a2 = jnp.concatenate([attn(q2, k2, v1), attn(q2, k2, v2)], axis=-1)
    a = a1 - _lambda_full(params) * a2
    ms = jnp.mean(a * a, axis=-1, keepdims=True)
    a = a * lax.rsqrt(ms + RMS_EPS) * params["subln_w"]
    a = a * (1.0 - LAMBDA_INIT)
    a = a.reshape(B, T, H * 2 * D)
    return a @ params["wo"]


# --------------------------------- main ---------------------------------------
if __name__ == "__main__":
    key = jax.random.PRNGKey(0)
    keys = jax.random.split(key, 9)
    params = {
        # nn.Linear weights stored as (in, out); y = x @ W (same semantics,
        # deterministic synthetic init).
        "wq": 0.02 * jax.random.normal(keys[0], (N_EMBD, N_EMBD), jnp.float32),
        "wk": 0.02 * jax.random.normal(keys[1], (N_EMBD, N_EMBD // N_REP), jnp.float32),
        "wv": 0.02 * jax.random.normal(keys[2], (N_EMBD, N_EMBD // N_REP), jnp.float32),
        "wo": 0.02 * jax.random.normal(keys[3], (N_EMBD, N_EMBD), jnp.float32),
        "lambda_q1": 0.1 * jax.random.normal(keys[4], (HEAD_DIM,), jnp.float32),
        "lambda_k1": 0.1 * jax.random.normal(keys[5], (HEAD_DIM,), jnp.float32),
        "lambda_q2": 0.1 * jax.random.normal(keys[6], (HEAD_DIM,), jnp.float32),
        "lambda_k2": 0.1 * jax.random.normal(keys[7], (HEAD_DIM,), jnp.float32),
        "subln_w": jnp.ones((2 * HEAD_DIM,), jnp.float32),   # RMSNorm gain init
    }
    x = jax.random.normal(keys[8], (BATCH, SEQ, N_EMBD), jnp.float32)

    fused = prepare_fused_params(params, SEQ, BATCH)   # one-time parameter repack
    out = jax.jit(multihead_diff_attn)(x, fused)       # single pallas_call inside jit
    out = jax.block_until_ready(out)
    assert out.shape == (BATCH, SEQ, N_EMBD)

    ref = reference_forward(x, params)
    err = float(jnp.max(jnp.abs(out - ref)))
    assert err < 2e-2, f"max abs err {err}"
    print("KERNEL_OK")
</pallas_src>

<mosaic_0001>
module attributes {stable_mosaic.version = 11 : i64} {
  func.func @_fused_diff_attn_kernel(%arg0: i32, %arg1: memref<32x64xbf16, #tpu.memory_space<vmem>>, %arg2: memref<64x384xbf16, #tpu.memory_space<vmem>>, %arg3: memref<2x32x128xf32, #tpu.memory_space<vmem>>, %arg4: memref<32x64xf32, #tpu.memory_space<vmem>>, %arg5: memref<64x64xbf16, #tpu.memory_space<vmem>>, %arg6: memref<32x64xf32, #tpu.memory_space<vmem>>) attributes {dimension_semantics = [#tpu.dimension_semantics<arbitrary>], iteration_bounds = array<i64: 1>, scalar_prefetch = 0 : i64, scratch_operands = 0 : i64, tpu.core_type = #tpu.core_type<tc>, window_params = [{pipeline_mode = #tpu.pipeline_mode<synchronous>, transform_indices = @transform_0, window_bounds = array<i64: 32, 64>}, {pipeline_mode = #tpu.pipeline_mode<synchronous>, transform_indices = @transform_1, window_bounds = array<i64: 64, 384>}, {pipeline_mode = #tpu.pipeline_mode<synchronous>, transform_indices = @transform_2, window_bounds = array<i64: 2, 32, 128>}, {pipeline_mode = #tpu.pipeline_mode<synchronous>, transform_indices = @transform_3, window_bounds = array<i64: 32, 64>}, {pipeline_mode = #tpu.pipeline_mode<synchronous>, transform_indices = @transform_4, window_bounds = array<i64: 64, 64>}, {pipeline_mode = #tpu.pipeline_mode<synchronous>, transform_indices = @transform_5, window_bounds = array<i64: 32, 64>}]} {
    %c0 = arith.constant 0 : index
    %c0_0 = arith.constant 0 : index
    %0 = vector.load %arg1[%c0, %c0_0] : memref<32x64xbf16, #tpu.memory_space<vmem>>, vector<32x64xbf16>
    %c0_1 = arith.constant 0 : index
    %c0_2 = arith.constant 0 : index
    %1 = vector.load %arg2[%c0_1, %c0_2] : memref<64x384xbf16, #tpu.memory_space<vmem>>, vector<64x384xbf16>
    %cst = arith.constant dense<0.000000e+00> : vector<32x384xf32>
    %2 = tpu.matmul %0, %1, %cst {dimension_numbers = #tpu.dot_dimension_numbers<[1], [0], [0], [1], [0, 0, 1, 1], [], []>} : vector<32x64xbf16>, vector<64x384xbf16>, vector<32x384xf32> -> vector<32x384xf32>
    %3 = vector.extract_strided_slice %2 {offsets = [0, 0], sizes = [32, 128], strides = [1, 1]} : vector<32x384xf32> to vector<32x128xf32>
    %c0_3 = arith.constant 0 : index
    %c0_4 = arith.constant 0 : index
    %c0_5 = arith.constant 0 : index
    %4 = vector.load %arg3[%c0_3, %c0_4, %c0_5] : memref<2x32x128xf32, #tpu.memory_space<vmem>>, vector<1x32x128xf32>
    %5 = vector.shape_cast %4 : vector<1x32x128xf32> to vector<32x128xf32>
    %6 = arith.mulf %3, %5 : vector<32x128xf32>
    %7 = vector.extract_strided_slice %2 {offsets = [0, 128], sizes = [32, 128], strides = [1, 1]} : vector<32x384xf32> to vector<32x128xf32>
    %c1 = arith.constant 1 : index
    %c0_6 = arith.constant 0 : index
    %c0_7 = arith.constant 0 : index
    %8 = vector.load %arg3[%c1, %c0_6, %c0_7] : memref<2x32x128xf32, #tpu.memory_space<vmem>>, vector<1x32x128xf32>
    %9 = vector.shape_cast %8 : vector<1x32x128xf32> to vector<32x128xf32>
    %10 = arith.mulf %7, %9 : vector<32x128xf32>
    %11 = arith.addf %6, %10 : vector<32x128xf32>
    %12 = vector.extract_strided_slice %2 {offsets = [0, 256], sizes = [32, 64], strides = [1, 1]} : vector<32x384xf32> to vector<32x64xf32>
    %13 = vector.extract_strided_slice %2 {offsets = [0, 320], sizes = [32, 64], strides = [1, 1]} : vector<32x384xf32> to vector<32x64xf32>
    %c0_8 = arith.constant 0 : index
    %c0_9 = arith.constant 0 : index
    %14 = vector.load %arg4[%c0_8, %c0_9] : memref<32x64xf32, #tpu.memory_space<vmem>>, vector<32x64xf32>
    %15 = tpu.iota {dimensions = array<i32: 1>} : vector<1x16xi32>
    %c8_i32 = arith.constant 8 : i32
    %16 = vector.broadcast %c8_i32 : i32 to vector<1x16xi32>
    %17 = arith.cmpi slt, %15, %16 : vector<1x16xi32>
    %18 = arith.extui %17 : vector<1x16xi1> to vector<1x16xi32>
    %19 = arith.sitofp %18 : vector<1x16xi32> to vector<1x16xf32>
    %cst_10 = arith.constant 1.000000e+00 : f32
    %20 = vector.broadcast %cst_10 : f32 to vector<1x16xf32>
    %21 = arith.subf %20, %19 : vector<1x16xf32>
    %22 = vector.extract_strided_slice %11 {offsets = [0, 0], sizes = [32, 16], strides = [1, 1]} : vector<32x128xf32> to vector<32x16xf32>
    %23 = vector.extract_strided_slice %11 {offsets = [0, 64], sizes = [32, 16], strides = [1, 1]} : vector<32x128xf32> to vector<32x16xf32>
    %24 = vector.broadcast %19 : vector<1x16xf32> to vector<32x16xf32>
    %25 = arith.mulf %23, %24 : vector<32x16xf32>
    %26 = vector.broadcast %21 : vector<1x16xf32> to vector<32x16xf32>
    %27 = arith.mulf %23, %26 : vector<32x16xf32>
    %28 = tpu.concatenate %25, %27 in 0 : vector<32x16xf32>, vector<32x16xf32> -> vector<64x16xf32>
    %29 = arith.truncf %22 : vector<32x16xf32> to vector<32x16xbf16>
    %30 = arith.truncf %28 : vector<64x16xf32> to vector<64x16xbf16>
    %cst_11 = arith.constant dense<0.000000e+00> : vector<32x64xf32>
    %31 = tpu.matmul %29, %30, %cst_11 {dimension_numbers = #tpu.dot_dimension_numbers<[1], [1], [0], [0], [0, 0, 1, 0], [], []>} : vector<32x16xbf16>, vector<64x16xbf16>, vector<32x64xf32> -> vector<32x64xf32>
    %32 = arith.addf %31, %14 : vector<32x64xf32>
    %33 = vector.extract_strided_slice %32 {offsets = [0, 0], sizes = [32, 32], strides = [1, 1]} : vector<32x64xf32> to vector<32x32xf32>
    %34 = vector.extract_strided_slice %32 {offsets = [0, 32], sizes = [32, 32], strides = [1, 1]} : vector<32x64xf32> to vector<32x32xf32>
    %cst_12 = arith.constant dense<0xFF800000> : vector<32xf32>
    %35 = vector.multi_reduction <maximumf>, %33, %cst_12 [1] : vector<32x32xf32> to vector<32xf32>
    %36 = vector.shape_cast %35 : vector<32xf32> to vector<32x1xf32>
    %37 = vector.broadcast %36 : vector<32x1xf32> to vector<32x32xf32>
    %38 = arith.subf %33, %37 : vector<32x32xf32>
    %39 = math.exp %38 : vector<32x32xf32>
    %cst_13 = arith.constant dense<0xFF800000> : vector<32xf32>
    %40 = vector.multi_reduction <maximumf>, %34, %cst_13 [1] : vector<32x32xf32> to vector<32xf32>
    %41 = vector.shape_cast %40 : vector<32xf32> to vector<32x1xf32>
    %42 = vector.broadcast %41 : vector<32x1xf32> to vector<32x32xf32>
    %43 = arith.subf %34, %42 : vector<32x32xf32>
    %44 = math.exp %43 : vector<32x32xf32>
    %cst_14 = arith.constant dense<0.000000e+00> : vector<32xf32>
    %45 = vector.multi_reduction <add>, %39, %cst_14 [1] : vector<32x32xf32> to vector<32xf32>
    %46 = vector.shape_cast %45 : vector<32xf32> to vector<32x1xf32>
    %47 = tpu.reciprocal %46 {approx = true} : vector<32x1xf32> -> vector<32x1xf32>
    %48 = vector.broadcast %47 : vector<32x1xf32> to vector<32x32xf32>
    %49 = arith.mulf %39, %48 : vector<32x32xf32>
    %cst_15 = arith.constant dense<0.000000e+00> : vector<32xf32>
    %50 = vector.multi_reduction <add>, %44, %cst_15 [1] : vector<32x32xf32> to vector<32xf32>
    %51 = vector.shape_cast %50 : vector<32xf32> to vector<32x1xf32>
    %52 = tpu.reciprocal %51 {approx = true} : vector<32x1xf32> -> vector<32x1xf32>
    %53 = vector.broadcast %52 : vector<32x1xf32> to vector<32x32xf32>
    %54 = arith.mulf %44, %53 : vector<32x32xf32>
    %55 = tpu.concatenate %49, %54 in 1 : vector<32x32xf32>, vector<32x32xf32> -> vector<32x64xf32>
    %56 = arith.truncf %55 : vector<32x64xf32> to vector<32x64xbf16>
    %57 = vector.extract_strided_slice %12 {offsets = [0, 0], sizes = [32, 16], strides = [1, 1]} : vector<32x64xf32> to vector<32x16xf32>
    %58 = vector.extract_strided_slice %13 {offsets = [0, 0], sizes = [32, 16], strides = [1, 1]} : vector<32x64xf32> to vector<32x16xf32>
    %59 = tpu.concatenate %57, %58 in 0 : vector<32x16xf32>, vector<32x16xf32> -> vector<64x16xf32>
    %60 = arith.truncf %59 : vector<64x16xf32> to vector<64x16xbf16>
    %cst_16 = arith.constant dense<0.000000e+00> : vector<32x16xf32>
    %61 = tpu.matmul %56, %60, %cst_16 {dimension_numbers = #tpu.dot_dimension_numbers<[1], [0], [0], [1], [0, 0, 1, 1], [], []>} : vector<32x64xbf16>, vector<64x16xbf16>, vector<32x16xf32> -> vector<32x16xf32>
    %62 = arith.mulf %61, %61 : vector<32x16xf32>
    %cst_17 = arith.constant dense<0.000000e+00> : vector<32xf32>
    %63 = vector.multi_reduction <add>, %62, %cst_17 [1] : vector<32x16xf32> to vector<32xf32>
    %64 = vector.shape_cast %63 : vector<32xf32> to vector<32x1xf32>
    %cst_18 = arith.constant 1.600000e+01 : f32
    %65 = vector.broadcast %cst_18 : f32 to vector<32x1xf32>
    %66 = arith.divf %64, %65 : vector<32x1xf32>
    %cst_19 = arith.constant 9.99999974E-6 : f32
    %67 = vector.broadcast %cst_19 : f32 to vector<32x1xf32>
    %68 = arith.addf %66, %67 : vector<32x1xf32>
    %69 = math.rsqrt %68 : vector<32x1xf32>
    %70 = vector.broadcast %69 : vector<32x1xf32> to vector<32x16xf32>
    %71 = arith.mulf %61, %70 : vector<32x16xf32>
    %72 = vector.extract_strided_slice %11 {offsets = [0, 16], sizes = [32, 16], strides = [1, 1]} : vector<32x128xf32> to vector<32x16xf32>
    %73 = vector.extract_strided_slice %11 {offsets = [0, 80], sizes = [32, 16], strides = [1, 1]} : vector<32x128xf32> to vector<32x16xf32>
    %74 = vector.broadcast %19 : vector<1x16xf32> to vector<32x16xf32>
    %75 = arith.mulf %73, %74 : vector<32x16xf32>
    %76 = vector.broadcast %21 : vector<1x16xf32> to vector<32x16xf32>
    %77 = arith.mulf %73, %76 : vector<32x16xf32>
    %78 = tpu.concatenate %75, %77 in 0 : vector<32x16xf32>, vector<32x16xf32> -> vector<64x16xf32>
    %79 = arith.truncf %72 : vector<32x16xf32> to vector<32x16xbf16>
    %80 = arith.truncf %78 : vector<64x16xf32> to vector<64x16xbf16>
    %cst_20 = arith.constant dense<0.000000e+00> : vector<32x64xf32>
    %81 = tpu.matmul %79, %80, %cst_20 {dimension_numbers = #tpu.dot_dimension_numbers<[1], [1], [0], [0], [0, 0, 1, 0], [], []>} : vector<32x16xbf16>, vector<64x16xbf16>, vector<32x64xf32> -> vector<32x64xf32>
    %82 = arith.addf %81, %14 : vector<32x64xf32>
    %83 = vector.extract_strided_slice %82 {offsets = [0, 0], sizes = [32, 32], strides = [1, 1]} : vector<32x64xf32> to vector<32x32xf32>
    %84 = vector.extract_strided_slice %82 {offsets = [0, 32], sizes = [32, 32], strides = [1, 1]} : vector<32x64xf32> to vector<32x32xf32>
    %cst_21 = arith.constant dense<0xFF800000> : vector<32xf32>
    %85 = vector.multi_reduction <maximumf>, %83, %cst_21 [1] : vector<32x32xf32> to vector<32xf32>
    %86 = vector.shape_cast %85 : vector<32xf32> to vector<32x1xf32>
    %87 = vector.broadcast %86 : vector<32x1xf32> to vector<32x32xf32>
    %88 = arith.subf %83, %87 : vector<32x32xf32>
    %89 = math.exp %88 : vector<32x32xf32>
    %cst_22 = arith.constant dense<0xFF800000> : vector<32xf32>
    %90 = vector.multi_reduction <maximumf>, %84, %cst_22 [1] : vector<32x32xf32> to vector<32xf32>
    %91 = vector.shape_cast %90 : vector<32xf32> to vector<32x1xf32>
    %92 = vector.broadcast %91 : vector<32x1xf32> to vector<32x32xf32>
    %93 = arith.subf %84, %92 : vector<32x32xf32>
    %94 = math.exp %93 : vector<32x32xf32>
    %cst_23 = arith.constant dense<0.000000e+00> : vector<32xf32>
    %95 = vector.multi_reduction <add>, %89, %cst_23 [1] : vector<32x32xf32> to vector<32xf32>
    %96 = vector.shape_cast %95 : vector<32xf32> to vector<32x1xf32>
    %97 = tpu.reciprocal %96 {approx = true} : vector<32x1xf32> -> vector<32x1xf32>
    %98 = vector.broadcast %97 : vector<32x1xf32> to vector<32x32xf32>
    %99 = arith.mulf %89, %98 : vector<32x32xf32>
    %cst_24 = arith.constant dense<0.000000e+00> : vector<32xf32>
    %100 = vector.multi_reduction <add>, %94, %cst_24 [1] : vector<32x32xf32> to vector<32xf32>
    %101 = vector.shape_cast %100 : vector<32xf32> to vector<32x1xf32>
    %102 = tpu.reciprocal %101 {approx = true} : vector<32x1xf32> -> vector<32x1xf32>
    %103 = vector.broadcast %102 : vector<32x1xf32> to vector<32x32xf32>
    %104 = arith.mulf %94, %103 : vector<32x32xf32>
    %105 = tpu.concatenate %99, %104 in 1 : vector<32x32xf32>, vector<32x32xf32> -> vector<32x64xf32>
    %106 = arith.truncf %105 : vector<32x64xf32> to vector<32x64xbf16>
    %107 = vector.extract_strided_slice %12 {offsets = [0, 16], sizes = [32, 16], strides = [1, 1]} : vector<32x64xf32> to vector<32x16xf32>
    %108 = vector.extract_strided_slice %13 {offsets = [0, 16], sizes = [32, 16], strides = [1, 1]} : vector<32x64xf32> to vector<32x16xf32>
    %109 = tpu.concatenate %107, %108 in 0 : vector<32x16xf32>, vector<32x16xf32> -> vector<64x16xf32>
    %110 = arith.truncf %109 : vector<64x16xf32> to vector<64x16xbf16>
    %cst_25 = arith.constant dense<0.000000e+00> : vector<32x16xf32>
    %111 = tpu.matmul %106, %110, %cst_25 {dimension_numbers = #tpu.dot_dimension_numbers<[1], [0], [0], [1], [0, 0, 1, 1], [], []>} : vector<32x64xbf16>, vector<64x16xbf16>, vector<32x16xf32> -> vector<32x16xf32>
    %112 = arith.mulf %111, %111 : vector<32x16xf32>
    %cst_26 = arith.constant dense<0.000000e+00> : vector<32xf32>
    %113 = vector.multi_reduction <add>, %112, %cst_26 [1] : vector<32x16xf32> to vector<32xf32>
    %114 = vector.shape_cast %113 : vector<32xf32> to vector<32x1xf32>
    %cst_27 = arith.constant 1.600000e+01 : f32
    %115 = vector.broadcast %cst_27 : f32 to vector<32x1xf32>
    %116 = arith.divf %114, %115 : vector<32x1xf32>
    %cst_28 = arith.constant 9.99999974E-6 : f32
    %117 = vector.broadcast %cst_28 : f32 to vector<32x1xf32>
    %118 = arith.addf %116, %117 : vector<32x1xf32>
    %119 = math.rsqrt %118 : vector<32x1xf32>
    %120 = vector.broadcast %119 : vector<32x1xf32> to vector<32x16xf32>
    %121 = arith.mulf %111, %120 : vector<32x16xf32>
    %122 = vector.extract_strided_slice %11 {offsets = [0, 32], sizes = [32, 16], strides = [1, 1]} : vector<32x128xf32> to vector<32x16xf32>
    %123 = vector.extract_strided_slice %11 {offsets = [0, 96], sizes = [32, 16], strides = [1, 1]} : vector<32x128xf32> to vector<32x16xf32>
    %124 = vector.broadcast %19 : vector<1x16xf32> to vector<32x16xf32>
    %125 = arith.mulf %123, %124 : vector<32x16xf32>
    %126 = vector.broadcast %21 : vector<1x16xf32> to vector<32x16xf32>
    %127 = arith.mulf %123, %126 : vector<32x16xf32>
    %128 = tpu.concatenate %125, %127 in 0 : vector<32x16xf32>, vector<32x16xf32> -> vector<64x16xf32>
    %129 = arith.truncf %122 : vector<32x16xf32> to vector<32x16xbf16>
    %130 = arith.truncf %128 : vector<64x16xf32> to vector<64x16xbf16>
    %cst_29 = arith.constant dense<0.000000e+00> : vector<32x64xf32>
    %131 = tpu.matmul %129, %130, %cst_29 {dimension_numbers = #tpu.dot_dimension_numbers<[1], [1], [0], [0], [0, 0, 1, 0], [], []>} : vector<32x16xbf16>, vector<64x16xbf16>, vector<32x64xf32> -> vector<32x64xf32>
    %132 = arith.addf %131, %14 : vector<32x64xf32>
    %133 = vector.extract_strided_slice %132 {offsets = [0, 0], sizes = [32, 32], strides = [1, 1]} : vector<32x64xf32> to vector<32x32xf32>
    %134 = vector.extract_strided_slice %132 {offsets = [0, 32], sizes = [32, 32], strides = [1, 1]} : vector<32x64xf32> to vector<32x32xf32>
    %cst_30 = arith.constant dense<0xFF800000> : vector<32xf32>
    %135 = vector.multi_reduction <maximumf>, %133, %cst_30 [1] : vector<32x32xf32> to vector<32xf32>
    %136 = vector.shape_cast %135 : vector<32xf32> to vector<32x1xf32>
    %137 = vector.broadcast %136 : vector<32x1xf32> to vector<32x32xf32>
    %138 = arith.subf %133, %137 : vector<32x32xf32>
    %139 = math.exp %138 : vector<32x32xf32>
    %cst_31 = arith.constant dense<0xFF800000> : vector<32xf32>
    %140 = vector.multi_reduction <maximumf>, %134, %cst_31 [1] : vector<32x32xf32> to vector<32xf32>
    %141 = vector.shape_cast %140 : vector<32xf32> to vector<32x1xf32>
    %142 = vector.broadcast %141 : vector<32x1xf32> to vector<32x32xf32>
    %143 = arith.subf %134, %142 : vector<32x32xf32>
    %144 = math.exp %143 : vector<32x32xf32>
    %cst_32 = arith.constant dense<0.000000e+00> : vector<32xf32>
    %145 = vector.multi_reduction <add>, %139, %cst_32 [1] : vector<32x32xf32> to vector<32xf32>
    %146 = vector.shape_cast %145 : vector<32xf32> to vector<32x1xf32>
    %147 = tpu.reciprocal %146 {approx = true} : vector<32x1xf32> -> vector<32x1xf32>
    %148 = vector.broadcast %147 : vector<32x1xf32> to vector<32x32xf32>
    %149 = arith.mulf %139, %148 : vector<32x32xf32>
    %cst_33 = arith.constant dense<0.000000e+00> : vector<32xf32>
    %150 = vector.multi_reduction <add>, %144, %cst_33 [1] : vector<32x32xf32> to vector<32xf32>
    %151 = vector.shape_cast %150 : vector<32xf32> to vector<32x1xf32>
    %152 = tpu.reciprocal %151 {approx = true} : vector<32x1xf32> -> vector<32x1xf32>
    %153 = vector.broadcast %152 : vector<32x1xf32> to vector<32x32xf32>
    %154 = arith.mulf %144, %153 : vector<32x32xf32>
    %155 = tpu.concatenate %149, %154 in 1 : vector<32x32xf32>, vector<32x32xf32> -> vector<32x64xf32>
    %156 = arith.truncf %155 : vector<32x64xf32> to vector<32x64xbf16>
    %157 = vector.extract_strided_slice %12 {offsets = [0, 32], sizes = [32, 16], strides = [1, 1]} : vector<32x64xf32> to vector<32x16xf32>
    %158 = vector.extract_strided_slice %13 {offsets = [0, 32], sizes = [32, 16], strides = [1, 1]} : vector<32x64xf32> to vector<32x16xf32>
    %159 = tpu.concatenate %157, %158 in 0 : vector<32x16xf32>, vector<32x16xf32> -> vector<64x16xf32>
    %160 = arith.truncf %159 : vector<64x16xf32> to vector<64x16xbf16>
    %cst_34 = arith.constant dense<0.000000e+00> : vector<32x16xf32>
    %161 = tpu.matmul %156, %160, %cst_34 {dimension_numbers = #tpu.dot_dimension_numbers<[1], [0], [0], [1], [0, 0, 1, 1], [], []>} : vector<32x64xbf16>, vector<64x16xbf16>, vector<32x16xf32> -> vector<32x16xf32>
    %162 = arith.mulf %161, %161 : vector<32x16xf32>
    %cst_35 = arith.constant dense<0.000000e+00> : vector<32xf32>
    %163 = vector.multi_reduction <add>, %162, %cst_35 [1] : vector<32x16xf32> to vector<32xf32>
    %164 = vector.shape_cast %163 : vector<32xf32> to vector<32x1xf32>
    %cst_36 = arith.constant 1.600000e+01 : f32
    %165 = vector.broadcast %cst_36 : f32 to vector<32x1xf32>
    %166 = arith.divf %164, %165 : vector<32x1xf32>
    %cst_37 = arith.constant 9.99999974E-6 : f32
    %167 = vector.broadcast %cst_37 : f32 to vector<32x1xf32>
    %168 = arith.addf %166, %167 : vector<32x1xf32>
    %169 = math.rsqrt %168 : vector<32x1xf32>
    %170 = vector.broadcast %169 : vector<32x1xf32> to vector<32x16xf32>
    %171 = arith.mulf %161, %170 : vector<32x16xf32>
    %172 = vector.extract_strided_slice %11 {offsets = [0, 48], sizes = [32, 16], strides = [1, 1]} : vector<32x128xf32> to vector<32x16xf32>
    %173 = vector.extract_strided_slice %11 {offsets = [0, 112], sizes = [32, 16], strides = [1, 1]} : vector<32x128xf32> to vector<32x16xf32>
    %174 = vector.broadcast %19 : vector<1x16xf32> to vector<32x16xf32>
    %175 = arith.mulf %173, %174 : vector<32x16xf32>
    %176 = vector.broadcast %21 : vector<1x16xf32> to vector<32x16xf32>
    %177 = arith.mulf %173, %176 : vector<32x16xf32>
    %178 = tpu.concatenate %175, %177 in 0 : vector<32x16xf32>, vector<32x16xf32> -> vector<64x16xf32>
    %179 = arith.truncf %172 : vector<32x16xf32> to vector<32x16xbf16>
    %180 = arith.truncf %178 : vector<64x16xf32> to vector<64x16xbf16>
    %cst_38 = arith.constant dense<0.000000e+00> : vector<32x64xf32>
    %181 = tpu.matmul %179, %180, %cst_38 {dimension_numbers = #tpu.dot_dimension_numbers<[1], [1], [0], [0], [0, 0, 1, 0], [], []>} : vector<32x16xbf16>, vector<64x16xbf16>, vector<32x64xf32> -> vector<32x64xf32>
    %182 = arith.addf %181, %14 : vector<32x64xf32>
    %183 = vector.extract_strided_slice %182 {offsets = [0, 0], sizes = [32, 32], strides = [1, 1]} : vector<32x64xf32> to vector<32x32xf32>
    %184 = vector.extract_strided_slice %182 {offsets = [0, 32], sizes = [32, 32], strides = [1, 1]} : vector<32x64xf32> to vector<32x32xf32>
    %cst_39 = arith.constant dense<0xFF800000> : vector<32xf32>
    %185 = vector.multi_reduction <maximumf>, %183, %cst_39 [1] : vector<32x32xf32> to vector<32xf32>
    %186 = vector.shape_cast %185 : vector<32xf32> to vector<32x1xf32>
    %187 = vector.broadcast %186 : vector<32x1xf32> to vector<32x32xf32>
    %188 = arith.subf %183, %187 : vector<32x32xf32>
    %189 = math.exp %188 : vector<32x32xf32>
    %cst_40 = arith.constant dense<0xFF800000> : vector<32xf32>
    %190 = vector.multi_reduction <maximumf>, %184, %cst_40 [1] : vector<32x32xf32> to vector<32xf32>
    %191 = vector.shape_cast %190 : vector<32xf32> to vector<32x1xf32>
    %192 = vector.broadcast %191 : vector<32x1xf32> to vector<32x32xf32>
    %193 = arith.subf %184, %192 : vector<32x32xf32>
    %194 = math.exp %193 : vector<32x32xf32>
    %cst_41 = arith.constant dense<0.000000e+00> : vector<32xf32>
    %195 = vector.multi_reduction <add>, %189, %cst_41 [1] : vector<32x32xf32> to vector<32xf32>
    %196 = vector.shape_cast %195 : vector<32xf32> to vector<32x1xf32>
    %197 = tpu.reciprocal %196 {approx = true} : vector<32x1xf32> -> vector<32x1xf32>
    %198 = vector.broadcast %197 : vector<32x1xf32> to vector<32x32xf32>
    %199 = arith.mulf %189, %198 : vector<32x32xf32>
    %cst_42 = arith.constant dense<0.000000e+00> : vector<32xf32>
    %200 = vector.multi_reduction <add>, %194, %cst_42 [1] : vector<32x32xf32> to vector<32xf32>
    %201 = vector.shape_cast %200 : vector<32xf32> to vector<32x1xf32>
    %202 = tpu.reciprocal %201 {approx = true} : vector<32x1xf32> -> vector<32x1xf32>
    %203 = vector.broadcast %202 : vector<32x1xf32> to vector<32x32xf32>
    %204 = arith.mulf %194, %203 : vector<32x32xf32>
    %205 = tpu.concatenate %199, %204 in 1 : vector<32x32xf32>, vector<32x32xf32> -> vector<32x64xf32>
    %206 = arith.truncf %205 : vector<32x64xf32> to vector<32x64xbf16>
    %207 = vector.extract_strided_slice %12 {offsets = [0, 48], sizes = [32, 16], strides = [1, 1]} : vector<32x64xf32> to vector<32x16xf32>
    %208 = vector.extract_strided_slice %13 {offsets = [0, 48], sizes = [32, 16], strides = [1, 1]} : vector<32x64xf32> to vector<32x16xf32>
    %209 = tpu.concatenate %207, %208 in 0 : vector<32x16xf32>, vector<32x16xf32> -> vector<64x16xf32>
    %210 = arith.truncf %209 : vector<64x16xf32> to vector<64x16xbf16>
    %cst_43 = arith.constant dense<0.000000e+00> : vector<32x16xf32>
    %211 = tpu.matmul %206, %210, %cst_43 {dimension_numbers = #tpu.dot_dimension_numbers<[1], [0], [0], [1], [0, 0, 1, 1], [], []>} : vector<32x64xbf16>, vector<64x16xbf16>, vector<32x16xf32> -> vector<32x16xf32>
    %212 = arith.mulf %211, %211 : vector<32x16xf32>
    %cst_44 = arith.constant dense<0.000000e+00> : vector<32xf32>
    %213 = vector.multi_reduction <add>, %212, %cst_44 [1] : vector<32x16xf32> to vector<32xf32>
    %214 = vector.shape_cast %213 : vector<32xf32> to vector<32x1xf32>
    %cst_45 = arith.constant 1.600000e+01 : f32
    %215 = vector.broadcast %cst_45 : f32 to vector<32x1xf32>
    %216 = arith.divf %214, %215 : vector<32x1xf32>
    %cst_46 = arith.constant 9.99999974E-6 : f32
    %217 = vector.broadcast %cst_46 : f32 to vector<32x1xf32>
    %218 = arith.addf %216, %217 : vector<32x1xf32>
    %219 = math.rsqrt %218 : vector<32x1xf32>
    %220 = vector.broadcast %219 : vector<32x1xf32> to vector<32x16xf32>
    %221 = arith.mulf %211, %220 : vector<32x16xf32>
    %222 = tpu.concatenate %71, %121, %171, %221 in 1 : vector<32x16xf32>, vector<32x16xf32>, vector<32x16xf32>, vector<32x16xf32> -> vector<32x64xf32>
    %223 = arith.truncf %222 : vector<32x64xf32> to vector<32x64xbf16>
    %c0_47 = arith.constant 0 : index
    %c0_48 = arith.constant 0 : index
    %224 = vector.load %arg5[%c0_47, %c0_48] : memref<64x64xbf16, #tpu.memory_space<vmem>>, vector<64x64xbf16>
    %cst_49 = arith.constant dense<0.000000e+00> : vector<32x64xf32>
    %225 = tpu.matmul %223, %224, %cst_49 {dimension_numbers = #tpu.dot_dimension_numbers<[1], [0], [0], [1], [0, 0, 1, 1], [], []>} : vector<32x64xbf16>, vector<64x64xbf16>, vector<32x64xf32> -> vector<32x64xf32>
    %c0_50 = arith.constant 0 : index
    %c0_51 = arith.constant 0 : index
    %226 = vector.load %arg6[%c0_50, %c0_51] : memref<32x64xf32, #tpu.memory_space<vmem>>, vector<32x64xf32>
    tpu.vector_store %arg6[%c0_50, %c0_51], %225 {strides = array<i32>} : memref<32x64xf32, #tpu.memory_space<vmem>>, vector<32x64xf32>,
    return
  }
  func.func @transform_0(%arg0: i32) -> (i32, i32) {
    %c0_i32 = arith.constant 0 : i32
    %c0_i32_0 = arith.constant 0 : i32
    %c0_i32_1 = arith.constant 0 : i32
    return %c0_i32, %c0_i32_0 : i32, i32
  }
  func.func @transform_1(%arg0: i32) -> (i32, i32) {
    %c0_i32 = arith.constant 0 : i32
    %c0_i32_0 = arith.constant 0 : i32
    %c0_i32_1 = arith.constant 0 : i32
    return %c0_i32, %c0_i32_0 : i32, i32
  }
  func.func @transform_2(%arg0: i32) -> (i32, i32, i32) {
    %c0_i32 = arith.constant 0 : i32
    %c0_i32_0 = arith.constant 0 : i32
    %c0_i32_1 = arith.constant 0 : i32
    %c0_i32_2 = arith.constant 0 : i32
    return %c0_i32, %c0_i32_0, %c0_i32_1 : i32, i32, i32
  }
  func.func @transform_3(%arg0: i32) -> (i32, i32) {
    %c0_i32 = arith.constant 0 : i32
    %c0_i32_0 = arith.constant 0 : i32
    %c0_i32_1 = arith.constant 0 : i32
    return %c0_i32, %c0_i32_0 : i32, i32
  }
  func.func @transform_4(%arg0: i32) -> (i32, i32) {
    %c0_i32 = arith.constant 0 : i32
    %c0_i32_0 = arith.constant 0 : i32
    %c0_i32_1 = arith.constant 0 : i32
    return %c0_i32, %c0_i32_0 : i32, i32
  }
  func.func @transform_5(%arg0: i32) -> (i32, i32) {
    %c0_i32 = arith.constant 0 : i32
    %c0_i32_0 = arith.constant 0 : i32
    %c0_i32_1 = arith.constant 0 : i32
    return %c0_i32, %c0_i32_0 : i32, i32
  }
}

</mosaic_0001>

<bundles_post_ra>
// kernel: multihead_diff_attn.1
= control target key start
LH: loop header
LB: loop body
LE: loop exit
PB: predicated region body
PF: predicated region fallthrough
CT: control target
= control target key end

     0   :  { %10 = vsyncpa [#allocation3], 0  ;;  %s2993_s0 = inlined_call_operand.vmem [shape: bf16[32,64], index: 0, kind: input, shape index: {}]   ;;  %s2994_s1 = inlined_call_operand.hbm [shape: bf16[64,384], index: 1, kind: input, shape index: {}]   ;;  %s2995_s2 = inlined_call_operand.hbm [shape: f32[2,32,128], index: 2, kind: input, shape index: {}]   ;;  %s2996_s3 = inlined_call_operand.vmem [shape: f32[32,64], index: 3, kind: input, shape index: {}]   ;;  %s2997_s4 = inlined_call_operand.vmem [shape: bf16[64,64], index: 4, kind: input, shape index: {}]   ;;  %s2998_s5 = inlined_call_operand.hbm [shape: f32[32,64], index: 5, kind: output, shape index: {}]  }
   0x1   :  { %11 = vsyncpa [#allocation6], 0 }
   0x2   :  { %12 = vsyncpa [#allocation4], 0  ;;  %s2265_s18 = smov [#allocation2]   ;;  %s2193_s22 = scalar_lea.hbm %s2994_s1, 1536 }
   0x3   :  { %s20_s19 = sshll.u32 %s2265_s18, 4  ;;  %p2194_p0 = scmp.ne.s32.totalorder %s2994_s1, %s2193_s22  ;;  %s21_s19 = int_to_ptr.vmem [resolvable:$true] %s20_s19 }
   0x4   :  { %p2197_p1 = scmp.lt.u32.totalorder %s2193_s22, %s2994_s1 }
   0x6   :  { %p2199_p2 = pnand %p2197_p1, %p2194_p0 }
   0x8   :  { %2202 = shalt.err (!%p2199_p2)
}
   0x9   :  { %s2203_s27 = scalar_lea.vmem %s21_s19, 1536  ;;  %p2208_p4 = scmp.lt.s32.totalorder %s21_s19, %s21_s19 }
   0xa   :  { %p2204_p3 = scmp.ne.s32.totalorder %s21_s19, %s2203_s27  ;;  %p2209_p5 = scmp.lt.s32.totalorder %s2203_s27, %s2203_s27 }
   0xc   :  { %p2210_p6 = por %p2209_p5, %p2208_p4 }
   0xe   :  { %p2211_p7 = pnand %p2210_p6, %p2204_p3 }
  0x10   :  { %2214 = shalt.err (!%p2211_p7)
}
  0x11   :  { %s2266_s28 = smov 192   ;;  %s2267_s29 = smov 12  }
  0x12   :  { %26 = dma.hbm_to_vmem [thread:$0]  %s2994_s1, 1536, %s21_s19, [#allocation3], %s2266_s28, %s2266_s28, %s2267_s29  }
  0x13   :  { %s2268_s7 = smov [#allocation5]   ;;  %s2215_s11 = scalar_lea.hbm %s2995_s2, 1024 }
  0x14   :  { %s32_s8 = sshll.u32 %s2268_s7, 4  ;;  %p2216_p8 = scmp.ne.s32.totalorder %s2995_s2, %s2215_s11  ;;  %s33_s8 = int_to_ptr.vmem [resolvable:$true] %s32_s8 }
  0x15   :  { %p2219_p9 = scmp.lt.u32.totalorder %s2215_s11, %s2995_s2 }
  0x17   :  { %p2221_p10 = pnand %p2219_p9, %p2216_p8 }
  0x19   :  { %2224 = shalt.err (!%p2221_p10)
}
  0x1a   :  { %s2225_s16 = scalar_lea.vmem %s33_s8, 1024  ;;  %p2230_p12 = scmp.lt.s32.totalorder %s33_s8, %s33_s8 }
  0x1b   :  { %p2226_p11 = scmp.ne.s32.totalorder %s33_s8, %s2225_s16  ;;  %p2231_p13 = scmp.lt.s32.totalorder %s2225_s16, %s2225_s16 }
  0x1d   :  { %p2232_p0 = por %p2231_p13, %p2230_p12 }
  0x1f   :  { %p2233_p1 = pnand %p2232_p0, %p2226_p11 }
  0x21   :  { %2236 = shalt.err (!%p2233_p1)
}
  0x22   :  { %s2269_s1 = smov 128   ;;  %s2270_s17 = smov 8  }
  0x23   :  { %38 = dma.hbm_to_vmem [thread:$0]  %s2995_s2, 1024, %s33_s8, [#allocation6], %s2269_s1, %s2269_s1, %s2270_s17  }
  0x24   :  { %2259 = dma.done.wait [#allocation3], 1536  }
  0x25   :  { %2260 = vsyncadd [#allocation3], 4294965760 }
  0x26   :  { %2261 = dma.done.wait [#allocation6], 1024  }
  0x27   :  { %2262 = vsyncadd [#allocation6], 4294966272  ;;  %v278_v0 = vlaneseq  ;;  %v2271_v1 = vmov 0   ;;  %v2272_v3 = vmov 0.0   ;;  %s2273_s20 = smov 64   ;;  %v2019_v12 = vld [vmem:[%s2993_s0] sm:$0xff]  }
  0x28   :  { %183 = vmatprep.mubr.bf16.mxu0 %v2271_v1  ;;  %v2007_v6 = vld [vmem:[#allocation2 + $0x4] ss:$12 sps:$4 sm:$0xff]   ;;  %v2009_v7 = vld [vmem:[#allocation2] ss:$12 sps:$4 sm:$0xff]   ;;  %v2010_v8 = vld [vmem:[#allocation2 + $0x1c] ss:$12 sps:$4 sm:$0xff]  }
  0x29   :  { %v279_v2 = vand.u32 127, %v278_v0  ;;  %151 = vmatprep.subr.bf16.mxu0 %v2007_v6  ;;  %v2012_v9 = vld [vmem:[#allocation2 + $0x18] ss:$12 sps:$4 sm:$0xff]   ;;  %v2013_v10 = vld [vmem:[#allocation2 + $0x34] ss:$12 sps:$4 sm:$0xff]   ;;  %vm144_vm1 = vcmask 523264  }
  0x2a   :  { %152 = vmatpush1.bf16.msra.mxu0 %v2009_v7  ;;  %v2015_v11 = vld [vmem:[#allocation2 + $0x30] ss:$12 sps:$4 sm:$0xff]   ;;  %v2016_v13 = vld [vmem:[#allocation2 + $0x4c] ss:$12 sps:$4 sm:$0xff]   ;;  %1823 = vmatprep.mubr.msk.bf16.mxu1 %vm144_vm1, %v2019_v12  ;;  %v2018_v14 = vld [vmem:[#allocation2 + $0x48] ss:$12 sps:$4 sm:$0xff]  }
  0x2b   :  { %vm280_vm0 = vcmp.lt.s32.totalorder %v279_v2, 8  ;;  %153 = vmatprep.subr.bf16.mxu0 %v2010_v8  ;;  %v2355_v15 = vld [vmem:[%s2993_s0 + $0x8] sm:$0xff]   ;;  %v253_v16 = vld [vmem:[#allocation5] sm:$0xff]  ;;  %v254_v20 = vld [vmem:[#allocation5 + $0x8] sm:$0xff]  ;;  %vm318_vm2 = vcmask 130048   ;;  %vm411_vm3 = vcmask 523520  }
  0x2c   :  { %v2338_v4 = vsel %vm280_vm0, 1.0, %v2272_v3  ;;  %v262_v18 = vld [vmem:[#allocation5 + $0x20] sm:$0xff]  ;;  %v263_v23 = vld [vmem:[#allocation5 + $0x28] sm:$0xff]  ;;  %v255_v32 = vld [vmem:[#allocation5 + $0x10] sm:$0xff]  ;;  %vm386_vm4 = vcmask 261120   ;;  %s2274_s6 = smov 96  }
  0x2d   :  { %285 = vrot.lane.b32.xlu0 %v2338_v4, %s2273_s20  ;;  %v2343_v5 = vsub.f32 1.0, %v2338_v4  ;;  %v264_v33 = vld [vmem:[#allocation5 + $0x30] sm:$0xff]  ;;  %v256_v36 = vld [vmem:[#allocation5 + $0x18] sm:$0xff]  ;;  %v2022_v60 = vld [vmem:[#allocation2 + $0x20] ss:$12 sps:$4 sm:$0xff]   ;;  %s2275_s7 = smov 80  }
  0x2e   :  { %154 = vmatpush1.bf16.msra.mxu0 %v2012_v9  ;;  %v265_v43 = vld [vmem:[#allocation5 + $0x38] sm:$0xff]  ;;  %v2021_v59 = vld [vmem:[#allocation2 + $0x8] ss:$12 sps:$4 sm:$0xff]   ;;  %s2276_s8 = smov 48   ;;  %s2277_s9 = smov 112   ;;  %vm1598_vm5 = vcmask 392192  }
  0x2f   :  { %155 = vmatprep.subr.bf16.mxu0 %v2013_v10  ;;  %1815 = vmatprep.subr.bf16.mxu1 %v2021_v59  ;;  %v2023_v8 = vld [vmem:[#allocation2 + $0x38] ss:$12 sps:$4 sm:$0xff]   ;;  %v2024_v9 = vld [vmem:[#allocation2 + $0x50] ss:$12 sps:$4 sm:$0xff]   ;;  %s2278_s10 = smov 32   ;;  %s2279_s11 = smov 16  }
  0x30   :  { %1816 = vmatpush3.bf16.msra.mxu1 %v2021_v59  ;;  %v2404_v10 = vld [vmem:[%s2996_s3] sm:$0xff] }
  0x31   :  { %293 = vrot.lane.b32.xlu0 %v2343_v5, %s2273_s20  ;;  %1817 = vmatprep.subr.bf16.mxu1 %v2022_v60 }
  0x32   :  { %156 = vmatpush1.bf16.msra.mxu0 %v2015_v11 }
  0x33   :  { %157 = vmatprep.subr.bf16.mxu0 %v2016_v13 }
  0x34   :  { %1818 = vmatpush3.bf16.msra.mxu1 %v2022_v60 }
  0x35   :  { %1819 = vmatprep.subr.bf16.mxu1 %v2023_v8 }
  0x36   :  { %158 = vmatpush1.bf16.msra.mxu0 %v2018_v14  ;;  %v2414_v14 = vld [vmem:[%s2996_s3 + $0x8] sm:$0xff] }
  0x38   :  { %1820 = vmatpush3.bf16.msra.mxu1 %v2023_v8 }
  0x39   :  { %1728 = vmatmul.mubr.msk.bf16.vlgmr.msra.gmra.mrb[0].mxu0 %vm144_vm1, %v2019_v12  ;;  %1821 = vmatprep.subr.bf16.mxu1 %v2024_v9  ;;  %v2409_v12 = vld [vmem:[%s2996_s3 + $0x10] sm:$0xff] }
  0x3a   :  { %193 = vmatprep.mubr.bf16.mxu0 %v2271_v1 }
  0x3c   :  { %1822 = vmatpush3.bf16.msra.mxu1 %v2024_v9 }
  0x3f   :  { %1824 = vmatmul.mubr.msk.bf16.vlgmr.msra.gmra.mrb[0].mxu1 %vm144_vm1, %v2355_v15 }
  0x41   :  { %1729 = vmatmul.mubr.msk.bf16.gmra.mrb[4].mxu0 %vm144_vm1, %v2355_v15 }
  0x9f   :  { %v286_v17 = vpop.permute.xlu0 %285 }
  0xa3   :  { %v294_v30 = vpop.permute.xlu0 %293 }
 0x10c   :  { %v185_v19 = vpop.f32.mrb[0].mxu0 }
 0x10d   :  { %v257_v21 = vmul.f32 %v253_v16, %v185_v19  ;;  %v187_v22 = vpop.f32.mrb[1].mxu0 }
 0x10e   :  { %v266_v24 = vmul.f32 %v262_v18, %v187_v22  ;;  %v189_v25 = vpop.f32.mrb[2].mxu0 }
 0x10f   :  { %v258_v26 = vmul.f32 %v254_v20, %v189_v25  ;;  %v191_v27 = vpop.f32.mrb[3].mxu0 }
 0x110   :  { %v2359_v28 = vadd.f32 %v266_v24, %v257_v21  ;;  %v267_v29 = vmul.f32 %v263_v23, %v191_v27  ;;  %v2430_v21 = vld [vmem:[%s2996_s3 + $0x18] sm:$0xff] }
 0x112   :  { %v2361_v31 = vadd.f32 %v267_v29, %v258_v26  ;;  %v296_v34 = vmul.f32 %v294_v30, %v2359_v28  ;;  %v288_v39 = vmul.f32 %v286_v17, %v2359_v28 }
 0x114   :  { %v195_v35 = vpop.f32.mrb[4].mxu0  ;;  %v2366_v37 = vpack.c.bf16 %v2361_v31, %v2359_v28  ;;  %v297_v38 = vmul.f32 %v294_v30, %v2361_v31  ;;  %v289_v40 = vmul.f32 %v286_v17, %v2361_v31 }
 0x115   :  { %v259_v41 = vmul.f32 %v255_v32, %v195_v35  ;;  %v197_v42 = vpop.f32.mrb[5].mxu0  ;;  %v2445_v32 = vpop.f32.mrb[0].mxu1 }
 0x116   :  { %v268_v44 = vmul.f32 %v264_v33, %v197_v42  ;;  %v199_v45 = vpop.f32.mrb[6].mxu0  ;;  %1835 = vmatprep.mubr.msk.bf16.mxu0 %vm318_vm2, %v2366_v37  ;;  %v304_v46 = vpack.c.bf16 %v297_v38, %v296_v34  ;;  %v302_v47 = vpack.c.bf16 %v289_v40, %v288_v39  ;;  %v238_v33 = vpop.f32.mrb[1].mxu1 }
 0x117   :  { %v260_v48 = vmul.f32 %v256_v36, %v199_v45  ;;  %v201_v49 = vpop.f32.mrb[7].mxu0  ;;  %v2447_v34 = vpop.f32.mrb[2].mxu1 }
 0x118   :  { %v2373_v50 = vadd.f32 %v268_v44, %v259_v41  ;;  %v269_v51 = vmul.f32 %v265_v43, %v201_v49  ;;  %314 = vrot.lane.b32.xlu0 %v304_v46, %s2273_s20  ;;  %310 = vrot.lane.b32.xlu1 %v302_v47, %s2273_s20  ;;  %v1972_v35 = vpack.i.bf16 %v2447_v34, %v2445_v32  ;;  %v241_v38 = vpop.f32.mrb[3].mxu1 }
 0x119   :  { %v2453_v36 = vpack.c.bf16 %v2447_v34, %v2445_v32  ;;  %v1967_v39 = vpack.i.bf16 %v241_v38, %v238_v33  ;;  %v2455_v40 = vpack.c.bf16 %v241_v38, %v238_v33 }
 0x11a   :  { %v2377_v52 = vadd.f32 %v269_v51, %v260_v48  ;;  %v290_v53 = vmul.f32 %v286_v17, %v2373_v50  ;;  %v298_v57 = vmul.f32 %v294_v30, %v2373_v50 }
 0x11b   :  { %1839 = vmatprep.subr.bf16.mxu1 %v2455_v40 }
 0x11c   :  { %v291_v54 = vmul.f32 %v286_v17, %v2377_v52  ;;  %v299_v56 = vmul.f32 %v294_v30, %v2377_v52  ;;  %v2395_v7 = vpack.c.bf16 %v2377_v52, %v2373_v50  ;;  %1840 = vmatpush3.bf16.msra.mxu1 %v2455_v40 }
 0x11d   :  { %1841 = vmatprep.subr.bf16.mxu1 %v2453_v36 }
 0x11e   :  { %v303_v55 = vpack.c.bf16 %v291_v54, %v290_v53  ;;  %v305_v58 = vpack.c.bf16 %v299_v56, %v298_v57 }
 0x120   :  { %312 = vrot.lane.b32.xlu1 %v303_v55, %s2273_s20  ;;  %1842 = vmatpush3.bf16.msra.mxu1 %v2453_v36 }
 0x124   :  { %316 = vrot.lane.b32.xlu1 %v305_v58, %s2273_s20 }
 0x18a   :  { %v311_v61 = vpop.permute.xlu1 %310  ;;  %v315_v1 = vpop.permute.xlu0 %314 }
 0x18b   :  { %1935 = vmatprep.subr.msk.bf16.mxu0 %vm318_vm2, %v311_v61  ;;  %v326_v62 = vsel %vm318_vm2, %v311_v61, 0  ;;  %v332_v2 = vsel %vm318_vm2, %v315_v1, 0 }
 0x18c   :  { %1828 = vmatpush3.bf16.xpose.msra.mxu0 %v326_v62 }
 0x192   :  { %v313_v63 = vpop.permute.xlu1 %312 }
 0x193   :  { %1936 = vmatprep.subr.msk.bf16.mxu0 %vm318_vm2, %v313_v63  ;;  %v329_v0 = vsel %vm318_vm2, %v313_v63, 0 }
 0x194   :  { %1830 = vmatpush3.bf16.xpose.msra.mxu0 %v329_v0 }
 0x195   :  { %1937 = vmatprep.subr.msk.bf16.mxu0 %vm318_vm2, %v315_v1 }
 0x196   :  { %v317_v3 = vpop.permute.xlu1 %316 }
 0x197   :  { %v335_v6 = vsel %vm318_vm2, %v317_v3, 0 }
 0x19c   :  { %1832 = vmatpush3.bf16.xpose.msra.mxu0 %v332_v2 }
 0x19d   :  { %1938 = vmatprep.subr.msk.bf16.mxu0 %vm318_vm2, %v317_v3 }
 0x1a4   :  { %1834 = vmatpush3.bf16.xpose.msra.mxu0 %v335_v6 }
 0x1ab   :  { %1836 = vmatmul.mubr.msk.bf16.vlgmr.msra.gmra.mrb[8].mxu0 %vm318_vm2, %v2395_v7 }
 0x27e   :  { %v1837_v11 = vpop.f32.mrb[8].mxu0 }
 0x27f   :  { %v371_v13 = vpop.f32.mrb[9].mxu0  ;;  %v2420_v18 = vadd.f32 %v1837_v11, %v2409_v12 }
 0x280   :  { %v2417_v15 = vadd.f32 %v371_v13, %v2404_v10  ;;  %v1838_v16 = vpop.f32.mrb[10].mxu0 }
 0x281   :  { %v374_v17 = vpop.f32.mrb[11].mxu0  ;;  %v383_v23 = vadd.f32 %v1838_v16, %v2430_v21  ;;  %v418_v24 = vsel %vm411_vm3, %v2420_v18, -inf  ;;  %v393_v27 = vsel %vm386_vm4, %v2420_v18, -inf }
 0x282   :  { %v2423_v19 = vadd.f32 %v374_v17, %v2414_v14  ;;  %v412_v20 = vsel %vm411_vm3, %v2417_v15, -inf  ;;  %v387_v25 = vsel %vm386_vm4, %v2417_v15, -inf }
 0x283   :  { %413 = vmax.xlane.f32.xlu0 %v412_v20  ;;  %v421_v26 = vsel %vm411_vm3, %v383_v23, -inf  ;;  %v396_v29 = vsel %vm386_vm4, %v383_v23, -inf }
 0x284   :  { %v415_v22 = vsel %vm411_vm3, %v2423_v19, -inf  ;;  %v390_v30 = vsel %vm386_vm4, %v2423_v19, -inf }
 0x285   :  { %416 = vmax.xlane.f32.xlu1 %v415_v22 }
 0x287   :  { %419 = vmax.xlane.f32.xlu0 %v418_v24 }
 0x289   :  { %388 = vmax.xlane.f32.xlu1 %v387_v25 }
 0x28b   :  { %422 = vmax.xlane.f32.xlu0 %v421_v26 }
 0x28d   :  { %394 = vmax.xlane.f32.xlu1 %v393_v27 }
 0x28f   :  { %397 = vmax.xlane.f32.xlu0 %v396_v29 }
 0x293   :  { %391 = vmax.xlane.f32.xlu0 %v390_v30 }
 0x310   :  { %v414_v41 = vpop.xlane.xlu0 %413 }
 0x311   :  { %v424_v42 = vsub.f32 %v2417_v15, %v414_v41 }
 0x312   :  { %v417_v43 = vpop.xlane.xlu1 %416 }
 0x313   :  { %v428_v44 = vmul.f32 1.442695, %v424_v42  ;;  %v425_v45 = vsub.f32 %v2423_v19, %v417_v43 }
 0x314   :  { %v420_v46 = vpop.xlane.xlu0 %419 }
 0x315   :  { %2029 = vpow2.f32 %v428_v44  ;;  %v430_v47 = vmul.f32 1.442695, %v425_v45  ;;  %v426_v48 = vsub.f32 %v2420_v18, %v420_v46 }
 0x316   :  { %v389_v59 = vpop.xlane.xlu1 %388 }
 0x317   :  { %2031 = vpow2.f32 %v430_v47  ;;  %v432_v49 = vmul.f32 1.442695, %v426_v48  ;;  %v399_v60 = vsub.f32 %v2417_v15, %v389_v59 }
 0x318   :  { %v423_v51 = vpop.xlane.xlu0 %422 }
 0x319   :  { %2033 = vpow2.f32 %v432_v49  ;;  %v427_v53 = vsub.f32 %v383_v23, %v423_v51  ;;  %v403_v62 = vmul.f32 1.442695, %v399_v60 }
 0x31a   :  { %v395_v0 = vpop.xlane.xlu1 %394 }
 0x31b   :  { %v434_v54 = vmul.f32 1.442695, %v427_v53  ;;  %v401_v2 = vsub.f32 %v2420_v18, %v395_v0 }
 0x31c   :  { %v398_v61 = vpop.xlane.xlu0 %397 }
 0x31d   :  { %2035 = vpow2.f32 %v434_v54  ;;  %v402_v63 = vsub.f32 %v383_v23, %v398_v61  ;;  %v407_v3 = vmul.f32 1.442695, %v401_v2 }
 0x31e   :  { %2037 = vpow2.f32 %v403_v62 }
 0x31f   :  { %v2464_v55 = vpop.eup %2029  ;;  %v409_v1 = vmul.f32 1.442695, %v402_v63 }
 0x320   :  { %460 = vrot.lane.b32.xlu1 %v2464_v55, %s2274_s6  ;;  %v392_v16 = vpop.xlane.xlu0 %391 }
 0x321   :  { %v2468_v56 = vpop.eup %2031  ;;  %2039 = vpow2.f32 %v409_v1  ;;  %v400_v17 = vsub.f32 %v2423_v19, %v392_v16 }
 0x322   :  { %462 = vrot.lane.b32.xlu0 %v2468_v56, %s2274_s6  ;;  %2041 = vpow2.f32 %v407_v3 }
 0x323   :  { %v2472_v57 = vpop.eup %2033  ;;  %v405_v18 = vmul.f32 1.442695, %v400_v17 }
 0x324   :  { %464 = vrot.lane.b32.xlu1 %v2472_v57, %s2274_s6 }
 0x325   :  { %2043 = vpow2.f32 %v405_v18 }
 0x326   :  { %606 = vrot.lane.b32.xlu0 %v2338_v4, %s2275_s7 }
 0x327   :  { %v2478_v58 = vpop.eup %2035 }
 0x328   :  { %466 = vrot.lane.b32.xlu1 %v2478_v58, %s2274_s6  ;;  %v2486_v6 = vpop.eup %2037 }
 0x329   :  { %v436_v8 = vsel %vm386_vm4, %v2486_v6, 0.0 }
 0x32b   :  { %v2490_v9 = vpop.eup %2039 }
 0x32c   :  { %613 = vrot.lane.b32.xlu1 %v2343_v5, %s2275_s7  ;;  %v445_v11 = vsel %vm386_vm4, %v2490_v9, 0.0  ;;  %v2494_v13 = vpop.eup %2041 }
 0x32d   :  { %v442_v15 = vsel %vm386_vm4, %v2494_v13, 0.0 }
 0x32f   :  { %v2500_v20 = vpop.eup %2043 }
 0x330   :  { %v439_v22 = vsel %vm386_vm4, %v2500_v20, 0.0 }
 0x345   :  { %437 = vadd.xlane.f32.xlu0 %v436_v8 }
 0x349   :  { %446 = vadd.xlane.f32.xlu0 %v445_v11 }
 0x350   :  { %443 = vadd.xlane.f32.xlu1 %v442_v15 }
 0x361   :  { %1968 = vrot.lane.b32.xlu1 %v1967_v39, %s2273_s20 }
 0x385   :  { %440 = vadd.xlane.f32.xlu1 %v439_v22 }
 0x392   :  { %v461_v23 = vpop.permute.xlu1 %460 }
 0x393   :  { %v472_v24 = vsel %vm386_vm4, %v461_v23, 0.0 }
 0x394   :  { %473 = vadd.xlane.f32.xlu0 %v472_v24  ;;  %v463_v27 = vpop.permute.xlu0 %462 }
 0x395   :  { %v475_v30 = vsel %vm386_vm4, %v463_v27, 0.0 }
 0x396   :  { %v465_v25 = vpop.permute.xlu1 %464 }
 0x397   :  { %v478_v26 = vsel %vm386_vm4, %v465_v25, 0.0 }
 0x398   :  { %479 = vadd.xlane.f32.xlu1 %v478_v26  ;;  %v607_v33 = vpop.permute.xlu0 %606 }
 0x399   :  { %v609_v38 = vmul.f32 %v607_v33, %v2359_v28  ;;  %v610_v39 = vmul.f32 %v607_v33, %v2361_v31  ;;  %v611_v42 = vmul.f32 %v607_v33, %v2373_v50  ;;  %v612_v43 = vmul.f32 %v607_v33, %v2377_v52 }
 0x39a   :  { %v467_v29 = vpop.permute.xlu1 %466 }
 0x39b   :  { %v481_v19 = vsel %vm386_vm4, %v467_v29, 0.0  ;;  %v620_v41 = vpack.c.bf16 %v610_v39, %v609_v38  ;;  %v621_v45 = vpack.c.bf16 %v612_v43, %v611_v42 }
 0x39c   :  { %482 = vadd.xlane.f32.xlu0 %v481_v19 }
 0x39e   :  { %v614_v44 = vpop.permute.xlu1 %613 }
 0x39f   :  { %v618_v46 = vmul.f32 %v614_v44, %v2373_v50  ;;  %v619_v47 = vmul.f32 %v614_v44, %v2377_v52  ;;  %v616_v49 = vmul.f32 %v614_v44, %v2359_v28  ;;  %v617_v51 = vmul.f32 %v614_v44, %v2361_v31 }
 0x3a0   :  { %476 = vadd.xlane.f32.xlu0 %v475_v30 }
 0x3a1   :  { %v623_v48 = vpack.c.bf16 %v619_v47, %v618_v46  ;;  %v622_v53 = vpack.c.bf16 %v617_v51, %v616_v49 }
 0x3a9   :  { %634 = vrot.lane.b32.xlu1 %v620_v41, %s2276_s8 }
 0x3ad   :  { %636 = vrot.lane.b32.xlu1 %v621_v45, %s2276_s8 }
 0x3b1   :  { %640 = vrot.lane.b32.xlu1 %v623_v48, %s2276_s8 }
 0x3b5   :  { %628 = vrot.lane.b32.xlu1 %v2395_v7, %s2277_s9 }
 0x3b6   :  { %1973 = vrot.lane.b32.xlu0 %v1972_v35, %s2273_s20 }
 0x3ba   :  { %638 = vrot.lane.b32.xlu0 %v622_v53, %s2276_s8 }
 0x3be   :  { %626 = vrot.lane.b32.xlu0 %v2366_v37, %s2277_s9 }
 0x3d2   :  { %v438_v63 = vpop.xlane.xlu0 %437 }
 0x3d3   :  { %2045 = vrcp.f32 %v438_v63 }
 0x3d6   :  { %v447_v0 = vpop.xlane.xlu0 %446 }
 0x3d7   :  { %2047 = vrcp.f32 %v447_v0 }
 0x3dd   :  { %v444_v54 = vpop.xlane.xlu1 %443  ;;  %v2046_v3 = vpop.eup %2045 }
 0x3de   :  { %v452_v38 = vmul.f32 %v2046_v3, %v2486_v6 }
 0x3e1   :  { %v1969_v59 = vpop.permute.xlu1 %1968  ;;  %v2048_v11 = vpop.eup %2047 }
 0x3e2   :  { %v1971_v60 = vunpack.i.h.bf16 %v1969_v59  ;;  %v1970_v61 = vunpack.i.l.bf16 %v1969_v59  ;;  %v455_v30 = vmul.f32 %v2048_v11, %v2490_v9 }
 0x3e4   :  { %v2528_v62 = vpack.c.bf16 %v1971_v60, %v1970_v61 }
 0x3e6   :  { %1843 = vmatprep.subr.bf16.mxu1 %v2528_v62 }
 0x3e7   :  { %1844 = vmatpush3.bf16.msra.mxu1 %v2528_v62 }
 0x412   :  { %v441_v32 = vpop.xlane.xlu1 %440 }
 0x421   :  { %v474_v34 = vpop.xlane.xlu0 %473 }
 0x422   :  { %2049 = vrcp.f32 %v474_v34 }
 0x425   :  { %v480_v35 = vpop.xlane.xlu1 %479 }
 0x429   :  { %v483_v1 = vpop.xlane.xlu0 %482  ;;  %v635_v29 = vpop.permute.xlu1 %634 }
 0x42a   :  { %2051 = vrcp.f32 %v483_v1 }
 0x42b   :  { %2053 = vrcp.f32 %v480_v35 }
 0x42c   :  { %2055 = vrcp.f32 %v441_v32  ;;  %v2050_v17 = vpop.eup %2049 }
 0x42d   :  { %2057 = vrcp.f32 %v444_v54  ;;  %v477_v2 = vpop.xlane.xlu0 %476  ;;  %v488_v27 = vmul.f32 %v2050_v17, %v2464_v55 }
 0x42e   :  { %2059 = vrcp.f32 %v477_v2 }
 0x42f   :  { %v492_v43 = vsel %vm386_vm4, %v452_v38, %v488_v27 }
 0x431   :  { %v1974_v8 = vpop.permute.xlu0 %1973 }
 0x432   :  { %v1976_v15 = vunpack.i.h.bf16 %v1974_v8  ;;  %v1975_v16 = vunpack.i.l.bf16 %v1974_v8 }
 0x434   :  { %v2052_v18 = vpop.eup %2051  ;;  %v2532_v22 = vpack.c.bf16 %v1976_v15, %v1975_v16 }
 0x435   :  { %v2054_v23 = vpop.eup %2053  ;;  %v491_v25 = vmul.f32 %v2052_v18, %v2478_v58  ;;  %v639_v41 = vpop.permute.xlu0 %638 }
 0x436   :  { %v2056_v24 = vpop.eup %2055  ;;  %1845 = vmatprep.subr.bf16.mxu1 %v2532_v22  ;;  %v490_v33 = vmul.f32 %v2054_v23, %v2472_v57  ;;  %v655_v46 = vsel %vm318_vm2, %v639_v41, 0 }
 0x437   :  { %v2058_v26 = vpop.eup %2057  ;;  %1846 = vmatpush3.bf16.msra.mxu1 %v2532_v22  ;;  %v453_v39 = vmul.f32 %v2056_v24, %v2500_v20  ;;  %v495_v55 = vsel %vm386_vm4, %v455_v30, %v491_v25  ;;  %v637_v20 = vpop.permute.xlu1 %636 }
 0x438   :  { %v2060_v19 = vpop.eup %2059  ;;  %1939 = vmatprep.subr.msk.bf16.mxu1 %vm318_vm2, %v635_v29  ;;  %v454_v42 = vmul.f32 %v2058_v26, %v2494_v13  ;;  %v652_v13 = vsel %vm318_vm2, %v637_v20, 0 }
 0x439   :  { %v489_v58 = vmul.f32 %v2060_v19, %v2468_v56  ;;  %v627_v6 = vpop.permute.xlu0 %626  ;;  %v649_v56 = vsel %vm318_vm2, %v635_v29, 0 }
 0x43a   :  { %v494_v57 = vsel %vm386_vm4, %v454_v42, %v490_v33 }
 0x43b   :  { %v493_v44 = vsel %vm386_vm4, %v453_v39, %v489_v58  ;;  %v497_v45 = vpack.c.bf16 %v495_v55, %v494_v57  ;;  %v641_v47 = vpop.permute.xlu1 %640 }
 0x43c   :  { %v496_v9 = vpack.c.bf16 %v493_v44, %v492_v43  ;;  %v658_v48 = vsel %vm318_vm2, %v641_v47, 0 }
 0x43e   :  { %1847 = vmatprep.mubr.msk.bf16.mxu1 %vm144_vm1, %v496_v9 }
 0x43f   :  { %1848 = vmatmul.mubr.msk.bf16.vlgmr.msra.gmra.mrb[4].mxu1 %vm144_vm1, %v497_v45  ;;  %v629_v49 = vpop.permute.xlu1 %628 }
 0x440   :  { %1852 = vmatpush3.bf16.xpose.msra.mxu1 %v649_v56  ;;  %1859 = vmatprep.mubr.msk.bf16.mxu1 %vm318_vm2, %v627_v6 }
 0x441   :  { %1940 = vmatprep.subr.msk.bf16.mxu1 %vm318_vm2, %v637_v20 }
 0x448   :  { %1854 = vmatpush3.bf16.xpose.msra.mxu1 %v652_v13 }
 0x449   :  { %1941 = vmatprep.subr.msk.bf16.mxu1 %vm318_vm2, %v639_v41 }
 0x450   :  { %1856 = vmatpush3.bf16.xpose.msra.mxu1 %v655_v46 }
 0x451   :  { %1942 = vmatprep.subr.msk.bf16.mxu1 %vm318_vm2, %v641_v47 }
 0x458   :  { %1858 = vmatpush3.bf16.xpose.msra.mxu1 %v658_v48 }
 0x45f   :  { %1860 = vmatmul.mubr.msk.bf16.vlgmr.msra.gmra.mrb[8].mxu1 %vm318_vm2, %v629_v49 }
 0x512   :  { %v2560_v51 = vpop.f32.mrb[4].mxu1 }
 0x513   :  { %v2562_v53 = vpop.f32.mrb[5].mxu1 }
 0x514   :  { %v2564_v54 = vpop.f32.mrb[6].mxu1 }
 0x515   :  { %v2566_v59 = vpop.f32.mrb[7].mxu1 }
 0x532   :  { %v1861_v60 = vpop.f32.mrb[8].mxu1 }
 0x533   :  { %v703_v61 = vadd.f32 %v1861_v60, %v2409_v12  ;;  %v694_v63 = vpop.f32.mrb[9].mxu1 }
 0x534   :  { %v1862_v0 = vpop.f32.mrb[10].mxu1  ;;  %v695_v32 = vadd.f32 %v694_v63, %v2404_v10 }
 0x535   :  { %v697_v34 = vpop.f32.mrb[11].mxu1  ;;  %v739_v35 = vsel %vm411_vm3, %v703_v61, -inf  ;;  %v706_v3 = vadd.f32 %v1862_v0, %v2430_v21  ;;  %v715_v16 = vsel %vm386_vm4, %v703_v61, -inf }
 0x536   :  { %v2572_v1 = vadd.f32 %v697_v34, %v2414_v14  ;;  %740 = vmax.xlane.f32.xlu0 %v739_v35  ;;  %v733_v8 = vsel %vm411_vm3, %v695_v32, -inf  ;;  %v709_v11 = vsel %vm386_vm4, %v695_v32, -inf }
 0x537   :  { %v742_v15 = vsel %vm411_vm3, %v706_v3, -inf  ;;  %v718_v17 = vsel %vm386_vm4, %v706_v3, -inf }
 0x538   :  { %v736_v2 = vsel %vm411_vm3, %v2572_v1, -inf  ;;  %v712_v18 = vsel %vm386_vm4, %v2572_v1, -inf }
 0x539   :  { %737 = vmax.xlane.f32.xlu1 %v736_v2 }
 0x53a   :  { %734 = vmax.xlane.f32.xlu0 %v733_v8 }
 0x53d   :  { %710 = vmax.xlane.f32.xlu1 %v709_v11 }
 0x53e   :  { %743 = vmax.xlane.f32.xlu0 %v742_v15 }
 0x541   :  { %716 = vmax.xlane.f32.xlu1 %v715_v16 }
 0x542   :  { %719 = vmax.xlane.f32.xlu0 %v718_v17 }
 0x552   :  { %929 = vrot.lane.b32.xlu1 %v2343_v5, %s2274_s6 }
 0x558   :  { %922 = vrot.lane.b32.xlu0 %v2338_v4, %s2274_s6 }
 0x577   :  { %713 = vmax.xlane.f32.xlu0 %v712_v18 }
 0x5c3   :  { %v741_v23 = vpop.xlane.xlu0 %740 }
 0x5c4   :  { %v747_v24 = vsub.f32 %v703_v61, %v741_v23 }
 0x5c6   :  { %v753_v25 = vmul.f32 1.442695, %v747_v24  ;;  %v738_v26 = vpop.xlane.xlu1 %737 }
 0x5c7   :  { %v746_v27 = vsub.f32 %v2572_v1, %v738_v26  ;;  %v735_v29 = vpop.xlane.xlu0 %734 }
 0x5c8   :  { %2061 = vpow2.f32 %v753_v25  ;;  %v745_v19 = vsub.f32 %v695_v32, %v735_v29 }
 0x5c9   :  { %v751_v30 = vmul.f32 1.442695, %v746_v27 }
 0x5ca   :  { %v749_v33 = vmul.f32 1.442695, %v745_v19  ;;  %v711_v44 = vpop.xlane.xlu1 %710 }
 0x5cb   :  { %2063 = vpow2.f32 %v751_v30  ;;  %v744_v38 = vpop.xlane.xlu0 %743  ;;  %v721_v9 = vsub.f32 %v695_v32, %v711_v44 }
 0x5cc   :  { %2065 = vpow2.f32 %v749_v33  ;;  %v748_v39 = vsub.f32 %v706_v3, %v744_v38 }
 0x5cd   :  { %v725_v57 = vmul.f32 1.442695, %v721_v9 }
 0x5ce   :  { %v755_v58 = vmul.f32 1.442695, %v748_v39  ;;  %v717_v45 = vpop.xlane.xlu1 %716 }
 0x5cf   :  { %v723_v6 = vsub.f32 %v703_v61, %v717_v45  ;;  %v720_v48 = vpop.xlane.xlu0 %719 }
 0x5d0   :  { %2067 = vpow2.f32 %v755_v58  ;;  %v724_v49 = vsub.f32 %v706_v3, %v720_v48 }
 0x5d1   :  { %2069 = vpow2.f32 %v725_v57  ;;  %v729_v56 = vmul.f32 1.442695, %v723_v6 }
 0x5d2   :  { %v2589_v41 = vpop.eup %2061  ;;  %v731_v60 = vmul.f32 1.442695, %v724_v49  ;;  %v930_v8 = vpop.permute.xlu1 %929 }
 0x5d3   :  { %785 = vrot.lane.b32.xlu1 %v2589_v41, %s2274_s6  ;;  %2071 = vpow2.f32 %v729_v56  ;;  %v923_v61 = vpop.permute.xlu0 %922  ;;  %v934_v29 = vmul.f32 %v930_v8, %v2373_v50  ;;  %v935_v19 = vmul.f32 %v930_v8, %v2377_v52  ;;  %v932_v58 = vmul.f32 %v930_v8, %v2359_v28 }
 0x5d4   :  { %2073 = vpow2.f32 %v731_v60  ;;  %v927_v25 = vmul.f32 %v923_v61, %v2373_v50  ;;  %v928_v26 = vmul.f32 %v923_v61, %v2377_v52  ;;  %v925_v33 = vmul.f32 %v923_v61, %v2359_v28 }
 0x5d5   :  { %v2593_v42 = vpop.eup %2063  ;;  %v939_v30 = vpack.c.bf16 %v935_v19, %v934_v29  ;;  %v926_v38 = vmul.f32 %v923_v61, %v2361_v31  ;;  %v933_v44 = vmul.f32 %v930_v8, %v2361_v31 }
 0x5d6   :  { %v2595_v55 = vpop.eup %2065  ;;  %783 = vrot.lane.b32.xlu0 %v2593_v42, %s2274_s6  ;;  %v937_v27 = vpack.c.bf16 %v928_v26, %v927_v25 }
 0x5d7   :  { %781 = vrot.lane.b32.xlu1 %v2595_v55, %s2274_s6  ;;  %v936_v39 = vpack.c.bf16 %v926_v38, %v925_v33  ;;  %v938_v9 = vpack.c.bf16 %v933_v44, %v932_v58 }
 0x5da   :  { %v2601_v43 = vpop.eup %2067 }
 0x5db   :  { %787 = vrot.lane.b32.xlu1 %v2601_v43, %s2274_s6  ;;  %v2605_v20 = vpop.eup %2069 }
 0x5dc   :  { %v757_v13 = vsel %vm386_vm4, %v2605_v20, 0.0 }
 0x5dd   :  { %v2609_v46 = vpop.eup %2071 }
 0x5de   :  { %v763_v47 = vsel %vm386_vm4, %v2609_v46, 0.0  ;;  %v2620_v32 = vpop.eup %2073 }
 0x5df   :  { %v766_v35 = vsel %vm386_vm4, %v2620_v32, 0.0 }
 0x5f5   :  { %758 = vadd.xlane.f32.xlu0 %v757_v13 }
 0x5ff   :  { %764 = vadd.xlane.f32.xlu1 %v763_v47 }
 0x604   :  { %v714_v63 = vpop.xlane.xlu0 %713 }
 0x605   :  { %v722_v0 = vsub.f32 %v2572_v1, %v714_v63 }
 0x607   :  { %v727_v34 = vmul.f32 1.442695, %v722_v0 }
 0x609   :  { %2075 = vpow2.f32 %v727_v34 }
 0x60b   :  { %825 = vrot.lane.b32.xlu0 %v2453_v36, %s2277_s9 }
 0x610   :  { %823 = vrot.lane.b32.xlu1 %v2455_v40, %s2277_s9 }
 0x613   :  { %v2624_v2 = vpop.eup %2075 }
 0x614   :  { %827 = vrot.lane.b32.xlu1 %v2528_v62, %s2277_s9  ;;  %v760_v3 = vsel %vm386_vm4, %v2624_v2, 0.0 }
 0x62a   :  { %767 = vadd.xlane.f32.xlu0 %v766_v35 }
 0x638   :  { %761 = vadd.xlane.f32.xlu1 %v760_v3 }
 0x645   :  { %v786_v11 = vpop.permute.xlu1 %785 }
 0x646   :  { %v799_v15 = vsel %vm386_vm4, %v786_v11, 0.0 }
 0x647   :  { %800 = vadd.xlane.f32.xlu1 %v799_v15 }
 0x648   :  { %v784_v23 = vpop.permute.xlu0 %783 }
 0x649   :  { %v782_v1 = vpop.permute.xlu1 %781  ;;  %v796_v24 = vsel %vm386_vm4, %v784_v23, 0.0 }
 0x64a   :  { %v793_v16 = vsel %vm386_vm4, %v782_v1, 0.0 }
 0x64b   :  { %794 = vadd.xlane.f32.xlu0 %v793_v16 }
 0x64d   :  { %v788_v17 = vpop.permute.xlu1 %787 }
 0x64e   :  { %v802_v18 = vsel %vm386_vm4, %v788_v17, 0.0 }
 0x64f   :  { %803 = vadd.xlane.f32.xlu0 %v802_v18 }
 0x653   :  { %797 = vadd.xlane.f32.xlu0 %v796_v24 }
 0x658   :  { %829 = vrot.lane.b32.xlu1 %v2532_v22, %s2277_s9 }
 0x65c   :  { %950 = vrot.lane.b32.xlu1 %v937_v27, %s2278_s10 }
 0x660   :  { %954 = vrot.lane.b32.xlu1 %v939_v30, %s2278_s10 }
 0x664   :  { %942 = vrot.lane.b32.xlu1 %v2395_v7, %s2274_s6 }
 0x669   :  { %948 = vrot.lane.b32.xlu0 %v936_v39, %s2278_s10 }
 0x66d   :  { %952 = vrot.lane.b32.xlu0 %v938_v9, %s2278_s10 }
 0x671   :  { %940 = vrot.lane.b32.xlu0 %v2366_v37, %s2274_s6 }
 0x682   :  { %v759_v57 = vpop.xlane.xlu0 %758 }
 0x683   :  { %2077 = vrcp.f32 %v759_v57 }
 0x686   :  { %v826_v56 = vpop.permute.xlu0 %825 }
 0x68c   :  { %v765_v45 = vpop.xlane.xlu1 %764 }
 0x68d   :  { %v2078_v34 = vpop.eup %2077 }
 0x68e   :  { %v773_v26 = vmul.f32 %v2078_v34, %v2605_v20 }
 0x690   :  { %v824_v6 = vpop.permute.xlu1 %823 }
 0x691   :  { %1863 = vmatprep.subr.bf16.mxu0 %v824_v6 }
 0x692   :  { %1864 = vmatpush3.bf16.msra.mxu0 %v824_v6 }
 0x693   :  { %1865 = vmatprep.subr.bf16.mxu0 %v826_v56 }
 0x694   :  { %v828_v13 = vpop.permute.xlu1 %827 }
 0x696   :  { %1866 = vmatpush3.bf16.msra.mxu0 %v826_v56 }
 0x697   :  { %1867 = vmatprep.subr.bf16.mxu0 %v828_v13 }
 0x69a   :  { %1868 = vmatpush3.bf16.msra.mxu0 %v828_v13 }
 0x6b7   :  { %v768_v48 = vpop.xlane.xlu0 %767 }
 0x6b8   :  { %2079 = vrcp.f32 %v768_v48 }
 0x6c2   :  { %v2080_v3 = vpop.eup %2079 }
 0x6c3   :  { %v776_v24 = vmul.f32 %v2080_v3, %v2620_v32 }
 0x6c5   :  { %v762_v47 = vpop.xlane.xlu1 %761 }
 0x6d4   :  { %v801_v49 = vpop.xlane.xlu1 %800 }
 0x6d8   :  { %v795_v60 = vpop.xlane.xlu0 %794  ;;  %v830_v61 = vpop.permute.xlu1 %829 }
 0x6d9   :  { %1869 = vmatprep.subr.bf16.mxu0 %v830_v61  ;;  %2081 = vrcp.f32 %v795_v60 }
 0x6da   :  { %1870 = vmatpush3.bf16.msra.mxu0 %v830_v61 }
 0x6dc   :  { %v804_v63 = vpop.xlane.xlu0 %803 }
 0x6dd   :  { %2083 = vrcp.f32 %v804_v63 }
 0x6de   :  { %2085 = vrcp.f32 %v801_v49 }
 0x6df   :  { %2087 = vrcp.f32 %v762_v47 }
 0x6e0   :  { %2089 = vrcp.f32 %v765_v45  ;;  %v798_v0 = vpop.xlane.xlu0 %797 }
 0x6e1   :  { %2091 = vrcp.f32 %v798_v0 }
 0x6e3   :  { %v2082_v8 = vpop.eup %2081 }
 0x6e4   :  { %v949_v35 = vpop.permute.xlu0 %948  ;;  %v809_v18 = vmul.f32 %v2082_v8, %v2595_v55 }
 0x6e5   :  { %1943 = vmatprep.subr.msk.bf16.mxu0 %vm318_vm2, %v949_v35 }
 0x6e7   :  { %v2084_v11 = vpop.eup %2083 }
 0x6e8   :  { %v2086_v15 = vpop.eup %2085  ;;  %v812_v16 = vmul.f32 %v2084_v11, %v2601_v43  ;;  %v953_v19 = vpop.permute.xlu0 %952  ;;  %v813_v43 = vsel %vm386_vm4, %v773_v26, %v809_v18 }
 0x6e9   :  { %v2088_v1 = vpop.eup %2087  ;;  %v811_v25 = vmul.f32 %v2086_v15, %v2589_v41  ;;  %v963_v41 = vsel %vm318_vm2, %v949_v35, 0 }
 0x6ea   :  { %v2090_v17 = vpop.eup %2089  ;;  %v774_v27 = vmul.f32 %v2088_v1, %v2624_v2  ;;  %v816_v33 = vsel %vm386_vm4, %v776_v24, %v812_v16  ;;  %v969_v2 = vsel %vm318_vm2, %v953_v19, 0 }
 0x6eb   :  { %v2092_v23 = vpop.eup %2091  ;;  %v775_v30 = vmul.f32 %v2090_v17, %v2609_v46 }
 0x6ec   :  { %v810_v29 = vmul.f32 %v2092_v23, %v2593_v42  ;;  %v941_v20 = vpop.permute.xlu0 %940  ;;  %v951_v42 = vpop.permute.xlu1 %950 }
 0x6ed   :  { %v815_v32 = vsel %vm386_vm4, %v775_v30, %v811_v25  ;;  %v966_v46 = vsel %vm318_vm2, %v951_v42, 0 }
 0x6ee   :  { %v814_v55 = vsel %vm386_vm4, %v774_v27, %v810_v29  ;;  %v818_v39 = vpack.c.bf16 %v816_v33, %v815_v32 }
 0x6ef   :  { %v817_v38 = vpack.c.bf16 %v814_v55, %v813_v43 }
 0x6f0   :  { %v955_v58 = vpop.permute.xlu1 %954 }
 0x6f1   :  { %1871 = vmatprep.mubr.msk.bf16.mxu0 %vm144_vm1, %v817_v38  ;;  %v972_v44 = vsel %vm318_vm2, %v955_v58, 0 }
 0x6f2   :  { %1872 = vmatmul.mubr.msk.bf16.vlgmr.msra.gmra.mrb[12].mxu0 %vm144_vm1, %v818_v39 }
 0x6f3   :  { %1876 = vmatpush3.bf16.xpose.msra.mxu0 %v963_v41  ;;  %1883 = vmatprep.mubr.msk.bf16.mxu0 %vm318_vm2, %v941_v20 }
 0x6f4   :  { %1944 = vmatprep.subr.msk.bf16.mxu0 %vm318_vm2, %v951_v42  ;;  %v943_v9 = vpop.permute.xlu1 %942 }
 0x6fb   :  { %1878 = vmatpush3.bf16.xpose.msra.mxu0 %v966_v46 }
 0x6fc   :  { %1945 = vmatprep.subr.msk.bf16.mxu0 %vm318_vm2, %v953_v19 }
 0x703   :  { %1880 = vmatpush3.bf16.xpose.msra.mxu0 %v969_v2 }
 0x704   :  { %1946 = vmatprep.subr.msk.bf16.mxu0 %vm318_vm2, %v955_v58 }
 0x70b   :  { %1882 = vmatpush3.bf16.xpose.msra.mxu0 %v972_v44 }
 0x712   :  { %1884 = vmatmul.mubr.msk.bf16.vlgmr.msra.gmra.mrb[16].mxu0 %vm318_vm2, %v943_v9 }
 0x7c5   :  { %v2674_v57 = vpop.f32.mrb[12].mxu0 }
 0x7c6   :  { %v2676_v45 = vpop.f32.mrb[13].mxu0 }
 0x7c7   :  { %v2678_v6 = vpop.f32.mrb[14].mxu0 }
 0x7c8   :  { %v2680_v56 = vpop.f32.mrb[15].mxu0 }
 0x7e5   :  { %v1885_v13 = vpop.f32.mrb[16].mxu0 }
 0x7e6   :  { %v1017_v47 = vadd.f32 %v1885_v13, %v2409_v12  ;;  %v1008_v48 = vpop.f32.mrb[17].mxu0 }
 0x7e7   :  { %v1886_v49 = vpop.f32.mrb[18].mxu0  ;;  %v1009_v60 = vadd.f32 %v1008_v48, %v2404_v10 }
 0x7e8   :  { %v1011_v61 = vpop.f32.mrb[19].mxu0  ;;  %v1053_v63 = vsel %vm411_vm3, %v1017_v47, -inf  ;;  %v1020_v35 = vadd.f32 %v1886_v49, %v2430_v21  ;;  %v1029_v8 = vsel %vm386_vm4, %v1017_v47, -inf }
 0x7e9   :  { %v2686_v0 = vadd.f32 %v1011_v61, %v2414_v14  ;;  %1054 = vmax.xlane.f32.xlu0 %v1053_v63  ;;  %v1047_v3 = vsel %vm411_vm3, %v1009_v60, -inf  ;;  %v1023_v12 = vsel %vm386_vm4, %v1009_v60, -inf }
 0x7ea   :  { %v1056_v10 = vsel %vm411_vm3, %v1020_v35, -inf  ;;  %v1032_v14 = vsel %vm386_vm4, %v1020_v35, -inf }
 0x7eb   :  { %v1050_v34 = vsel %vm411_vm3, %v2686_v0, -inf  ;;  %v1026_v21 = vsel %vm386_vm4, %v2686_v0, -inf }
 0x7ec   :  { %1051 = vmax.xlane.f32.xlu1 %v1050_v34 }
 0x7ed   :  { %1048 = vmax.xlane.f32.xlu0 %v1047_v3 }
 0x7f0   :  { %1024 = vmax.xlane.f32.xlu1 %v1023_v12 }
 0x7f1   :  { %1057 = vmax.xlane.f32.xlu0 %v1056_v10 }
 0x7f4   :  { %1030 = vmax.xlane.f32.xlu1 %v1029_v8 }
 0x7f5   :  { %1033 = vmax.xlane.f32.xlu0 %v1032_v14 }
 0x805   :  { %1239 = vrot.lane.b32.xlu1 %v2343_v5, %s2277_s9 }
 0x80b   :  { %1232 = vrot.lane.b32.xlu0 %v2338_v4, %s2277_s9 }
 0x82a   :  { %1027 = vmax.xlane.f32.xlu0 %v1026_v21 }
 0x876   :  { %v1055_v11 = vpop.xlane.xlu0 %1054 }
 0x877   :  { %v1061_v15 = vsub.f32 %v1017_v47, %v1055_v11 }
 0x879   :  { %v1067_v1 = vmul.f32 1.442695, %v1061_v15  ;;  %v1052_v16 = vpop.xlane.xlu1 %1051 }
 0x87a   :  { %v1060_v17 = vsub.f32 %v2686_v0, %v1052_v16  ;;  %v1049_v18 = vpop.xlane.xlu0 %1048 }
 0x87b   :  { %2093 = vpow2.f32 %v1067_v1  ;;  %v1059_v23 = vsub.f32 %v1009_v60, %v1049_v18 }
 0x87c   :  { %v1065_v24 = vmul.f32 1.442695, %v1060_v17 }
 0x87d   :  { %v1063_v25 = vmul.f32 1.442695, %v1059_v23  ;;  %v1025_v33 = vpop.xlane.xlu1 %1024 }
 0x87e   :  { %2095 = vpow2.f32 %v1065_v24  ;;  %v1058_v5 = vpop.xlane.xlu0 %1057  ;;  %v1035_v43 = vsub.f32 %v1009_v60, %v1025_v33 }
 0x87f   :  { %2097 = vpow2.f32 %v1063_v25  ;;  %v1062_v26 = vsub.f32 %v1020_v35, %v1058_v5 }
 0x880   :  { %v1039_v55 = vmul.f32 1.442695, %v1035_v43 }
 0x881   :  { %v1069_v4 = vmul.f32 1.442695, %v1062_v26  ;;  %v1031_v38 = vpop.xlane.xlu1 %1030 }
 0x882   :  { %v1037_v32 = vsub.f32 %v1017_v47, %v1031_v38  ;;  %v1034_v2 = vpop.xlane.xlu0 %1033 }
 0x883   :  { %2099 = vpow2.f32 %v1069_v4  ;;  %v1038_v58 = vsub.f32 %v1020_v35, %v1034_v2 }
 0x884   :  { %2101 = vpow2.f32 %v1039_v55  ;;  %v1043_v39 = vmul.f32 1.442695, %v1037_v32 }
 0x885   :  { %v2703_v27 = vpop.eup %2093  ;;  %v1045_v44 = vmul.f32 1.442695, %v1038_v58  ;;  %v1240_v34 = vpop.permute.xlu1 %1239 }
 0x886   :  { %1099 = vrot.lane.b32.xlu1 %v2703_v27, %s2274_s6  ;;  %2103 = vpow2.f32 %v1043_v39  ;;  %v1233_v9 = vpop.permute.xlu0 %1232  ;;  %v1244_v1 = vmul.f32 %v1240_v34, %v2373_v50  ;;  %v1245_v16 = vmul.f32 %v1240_v34, %v2377_v52  ;;  %v1242_v25 = vmul.f32 %v1240_v34, %v2359_v28 }
 0x887   :  { %2105 = vpow2.f32 %v1045_v44  ;;  %v1237_v11 = vmul.f32 %v1233_v9, %v2373_v50  ;;  %v1238_v15 = vmul.f32 %v1233_v9, %v2377_v52  ;;  %v1235_v23 = vmul.f32 %v1233_v9, %v2359_v28 }
 0x888   :  { %v2707_v29 = vpop.eup %2095  ;;  %v1249_v18 = vpack.c.bf16 %v1245_v16, %v1244_v1  ;;  %v1236_v24 = vmul.f32 %v1233_v9, %v2361_v31  ;;  %v1243_v50 = vmul.f32 %v1240_v34, %v2361_v31 }
 0x889   :  { %v2709_v19 = vpop.eup %2097  ;;  %1097 = vrot.lane.b32.xlu0 %v2707_v29, %s2274_s6  ;;  %v1247_v17 = vpack.c.bf16 %v1238_v15, %v1237_v11 }
 0x88a   :  { %1095 = vrot.lane.b32.xlu1 %v2709_v19, %s2274_s6  ;;  %v1246_v5 = vpack.c.bf16 %v1236_v24, %v1235_v23  ;;  %v1248_v52 = vpack.c.bf16 %v1243_v50, %v1242_v25 }
 0x88d   :  { %v2715_v30 = vpop.eup %2099 }
 0x88e   :  { %1101 = vrot.lane.b32.xlu1 %v2715_v30, %s2274_s6  ;;  %v2719_v41 = vpop.eup %2101 }
 0x88f   :  { %v1071_v20 = vsel %vm386_vm4, %v2719_v41, 0.0 }
 0x890   :  { %v2723_v42 = vpop.eup %2103 }
 0x891   :  { %v1077_v46 = vsel %vm386_vm4, %v2723_v42, 0.0  ;;  %v2734_v48 = vpop.eup %2105 }
 0x892   :  { %v1080_v60 = vsel %vm386_vm4, %v2734_v48, 0.0 }
 0x8a8   :  { %1072 = vadd.xlane.f32.xlu0 %v1071_v20 }
 0x8b2   :  { %1078 = vadd.xlane.f32.xlu1 %v1077_v46 }
 0x8b7   :  { %v1028_v13 = vpop.xlane.xlu0 %1027 }
 0x8b8   :  { %v1036_v47 = vsub.f32 %v2686_v0, %v1028_v13 }
 0x8ba   :  { %v1041_v49 = vmul.f32 1.442695, %v1036_v47 }
 0x8bc   :  { %2107 = vpow2.f32 %v1041_v49 }
 0x8be   :  { %1135 = vrot.lane.b32.xlu0 %v2453_v36, %s2274_s6 }
 0x8c3   :  { %1133 = vrot.lane.b32.xlu1 %v2455_v40, %s2274_s6 }
 0x8c6   :  { %v2738_v61 = vpop.eup %2107 }
 0x8c7   :  { %1137 = vrot.lane.b32.xlu1 %v2528_v62, %s2274_s6  ;;  %v1074_v63 = vsel %vm386_vm4, %v2738_v61, 0.0 }
 0x8dd   :  { %1081 = vadd.xlane.f32.xlu0 %v1080_v60 }
 0x8eb   :  { %1075 = vadd.xlane.f32.xlu1 %v1074_v63 }
 0x8f8   :  { %v1100_v35 = vpop.permute.xlu1 %1099 }
 0x8f9   :  { %v1113_v3 = vsel %vm386_vm4, %v1100_v35, 0.0 }
 0x8fa   :  { %1114 = vadd.xlane.f32.xlu1 %v1113_v3 }
 0x8fb   :  { %v1098_v14 = vpop.permute.xlu0 %1097 }
 0x8fc   :  { %v1096_v0 = vpop.permute.xlu1 %1095  ;;  %v1110_v21 = vsel %vm386_vm4, %v1098_v14, 0.0 }
 0x8fd   :  { %v1107_v12 = vsel %vm386_vm4, %v1096_v0, 0.0 }
 0x8fe   :  { %1108 = vadd.xlane.f32.xlu0 %v1107_v12 }
 0x900   :  { %v1102_v10 = vpop.permute.xlu1 %1101 }
 0x901   :  { %v1116_v8 = vsel %vm386_vm4, %v1102_v10, 0.0 }
 0x902   :  { %1117 = vadd.xlane.f32.xlu0 %v1116_v8 }
 0x906   :  { %1111 = vadd.xlane.f32.xlu0 %v1110_v21 }
 0x90b   :  { %1139 = vrot.lane.b32.xlu1 %v2532_v22, %s2274_s6 }
 0x90f   :  { %1260 = vrot.lane.b32.xlu1 %v1247_v17, %s2279_s11 }
 0x913   :  { %1264 = vrot.lane.b32.xlu1 %v1249_v18, %s2279_s11 }
 0x917   :  { %1252 = vrot.lane.b32.xlu1 %v2395_v7, %s2275_s7 }
 0x91c   :  { %1258 = vrot.lane.b32.xlu0 %v1246_v5, %s2279_s11  ;;  %v2189_v5 = vld [vmem:[%s2996_s3] sm:$0xff] }
 0x920   :  { %1262 = vrot.lane.b32.xlu0 %v1248_v52, %s2279_s11 }
 0x924   :  { %1250 = vrot.lane.b32.xlu0 %v2366_v37, %s2275_s7 }
 0x935   :  { %v1073_v26 = vpop.xlane.xlu0 %1072 }
 0x936   :  { %2109 = vrcp.f32 %v1073_v26 }
 0x939   :  { %v1136_v43 = vpop.permute.xlu0 %1135 }
 0x93f   :  { %v1079_v4 = vpop.xlane.xlu1 %1078 }
 0x940   :  { %v2110_v20 = vpop.eup %2109 }
 0x941   :  { %v1087_v3 = vmul.f32 %v2110_v20, %v2719_v41 }
 0x943   :  { %v1134_v33 = vpop.permute.xlu1 %1133 }
 0x944   :  { %1887 = vmatprep.subr.bf16.mxu1 %v1134_v33 }
 0x945   :  { %1888 = vmatpush3.bf16.msra.mxu1 %v1134_v33  ;;  %v2190_v33 = vld [vmem:[%s2996_s3 + $0x10] sm:$0xff] }
 0x946   :  { %1889 = vmatprep.subr.bf16.mxu1 %v1136_v43 }
 0x947   :  { %v1138_v7 = vpop.permute.xlu1 %1137 }
 0x949   :  { %1890 = vmatpush3.bf16.msra.mxu1 %v1136_v43 }
 0x94a   :  { %1891 = vmatprep.subr.bf16.mxu1 %v1138_v7 }
 0x94d   :  { %1892 = vmatpush3.bf16.msra.mxu1 %v1138_v7  ;;  %v2191_v7 = vld [vmem:[%s2996_s3 + $0x8] sm:$0xff] }
 0x96a   :  { %v1082_v31 = vpop.xlane.xlu0 %1081 }
 0x96b   :  { %2111 = vrcp.f32 %v1082_v31 }
 0x975   :  { %v2112_v2 = vpop.eup %2111 }
 0x976   :  { %v1090_v34 = vmul.f32 %v2112_v2, %v2734_v48 }
 0x978   :  { %v1076_v28 = vpop.xlane.xlu1 %1075 }
 0x987   :  { %v1115_v55 = vpop.xlane.xlu1 %1114 }
 0x98b   :  { %v1109_v38 = vpop.xlane.xlu0 %1108  ;;  %v1140_v32 = vpop.permute.xlu1 %1139 }
 0x98c   :  { %1893 = vmatprep.subr.bf16.mxu1 %v1140_v32  ;;  %2113 = vrcp.f32 %v1109_v38  ;;  %v2192_v38 = vld [vmem:[%s2996_s3 + $0x18] sm:$0xff] }
 0x98d   :  { %1894 = vmatpush3.bf16.msra.mxu1 %v1140_v32 }
 0x98f   :  { %v1118_v37 = vpop.xlane.xlu0 %1117 }
 0x990   :  { %2115 = vrcp.f32 %v1118_v37 }
 0x991   :  { %2117 = vrcp.f32 %v1115_v55 }
 0x992   :  { %2119 = vrcp.f32 %v1076_v28 }
 0x993   :  { %2121 = vrcp.f32 %v1079_v4  ;;  %v1112_v39 = vpop.xlane.xlu0 %1111 }
 0x994   :  { %2123 = vrcp.f32 %v1112_v39 }
 0x996   :  { %v2114_v58 = vpop.eup %2113 }
 0x997   :  { %v1259_v46 = vpop.permute.xlu0 %1258  ;;  %v1123_v60 = vmul.f32 %v2114_v58, %v2709_v19 }
 0x998   :  { %1947 = vmatprep.subr.msk.bf16.mxu1 %vm318_vm2, %v1259_v46 }
 0x99a   :  { %v2116_v44 = vpop.eup %2115 }
 0x99b   :  { %v2118_v9 = vpop.eup %2117  ;;  %v1126_v47 = vmul.f32 %v2116_v44, %v2715_v30  ;;  %v1263_v10 = vpop.permute.xlu0 %1262  ;;  %v1127_v30 = vsel %vm386_vm4, %v1087_v3, %v1123_v60 }
 0x99c   :  { %v2120_v13 = vpop.eup %2119  ;;  %v1125_v35 = vmul.f32 %v2118_v9, %v2703_v27  ;;  %v1273_v27 = vsel %vm318_vm2, %v1259_v46, 0 }
 0x99d   :  { %v2122_v49 = vpop.eup %2121  ;;  %v1088_v0 = vmul.f32 %v2120_v13, %v2738_v61  ;;  %v1130_v14 = vsel %vm386_vm4, %v1090_v34, %v1126_v47  ;;  %v1279_v61 = vsel %vm318_vm2, %v1263_v10, 0 }
 0x99e   :  { %v2124_v63 = vpop.eup %2123  ;;  %v1089_v8 = vmul.f32 %v2122_v49, %v2723_v42 }
 0x99f   :  { %v1124_v12 = vmul.f32 %v2124_v63, %v2707_v29  ;;  %v1251_v41 = vpop.permute.xlu0 %1250  ;;  %v1261_v29 = vpop.permute.xlu1 %1260 }
 0x9a0   :  { %v1129_v48 = vsel %vm386_vm4, %v1089_v8, %v1125_v35  ;;  %v1276_v42 = vsel %vm318_vm2, %v1261_v29, 0 }
 0x9a1   :  { %v1128_v19 = vsel %vm386_vm4, %v1088_v0, %v1124_v12  ;;  %v1132_v11 = vpack.c.bf16 %v1130_v14, %v1129_v48 }
 0x9a2   :  { %v1131_v21 = vpack.c.bf16 %v1128_v19, %v1127_v30 }
 0x9a3   :  { %v1265_v15 = vpop.permute.xlu1 %1264 }
 0x9a4   :  { %1895 = vmatprep.mubr.msk.bf16.mxu1 %vm144_vm1, %v1131_v21  ;;  %v1282_v1 = vsel %vm318_vm2, %v1265_v15, 0 }
 0x9a5   :  { %1896 = vmatmul.mubr.msk.bf16.vlgmr.msra.gmra.mrb[12].mxu1 %vm144_vm1, %v1132_v11 }
 0x9a6   :  { %1900 = vmatpush3.bf16.xpose.msra.mxu1 %v1273_v27  ;;  %1907 = vmatprep.mubr.msk.bf16.mxu1 %vm318_vm2, %v1251_v41 }
 0x9a7   :  { %1948 = vmatprep.subr.msk.bf16.mxu1 %vm318_vm2, %v1261_v29  ;;  %v1253_v16 = vpop.permute.xlu1 %1252 }
 0x9ae   :  { %1902 = vmatpush3.bf16.xpose.msra.mxu1 %v1276_v42 }
 0x9af   :  { %1949 = vmatprep.subr.msk.bf16.mxu1 %vm318_vm2, %v1263_v10 }
 0x9b6   :  { %1904 = vmatpush3.bf16.xpose.msra.mxu1 %v1279_v61 }
 0x9b7   :  { %1950 = vmatprep.subr.msk.bf16.mxu1 %vm318_vm2, %v1265_v15 }
 0x9be   :  { %1906 = vmatpush3.bf16.xpose.msra.mxu1 %v1282_v1 }
 0x9c5   :  { %1908 = vmatmul.mubr.msk.bf16.vlgmr.msra.gmra.mrb[16].mxu1 %vm318_vm2, %v1253_v16 }
 0xa78   :  { %v2788_v17 = vpop.f32.mrb[12].mxu1 }
 0xa79   :  { %v2790_v18 = vpop.f32.mrb[13].mxu1 }
 0xa7a   :  { %v2792_v23 = vpop.f32.mrb[14].mxu1 }
 0xa7b   :  { %v2794_v24 = vpop.f32.mrb[15].mxu1 }
 0xa98   :  { %v1909_v25 = vpop.f32.mrb[16].mxu1 }
 0xa99   :  { %v1318_v50 = vpop.f32.mrb[17].mxu1  ;;  %v1327_v43 = vadd.f32 %v2190_v33, %v1909_v25 }
 0xa9a   :  { %v1319_v52 = vadd.f32 %v2189_v5, %v1318_v50  ;;  %v1910_v26 = vpop.f32.mrb[18].mxu1 }
 0xa9b   :  { %v1321_v4 = vpop.f32.mrb[19].mxu1  ;;  %v1330_v32 = vadd.f32 %v2192_v38, %v1910_v26  ;;  %v1363_v37 = vsel %vm411_vm3, %v1327_v43, -inf  ;;  %v1339_v46 = vsel %vm386_vm4, %v1327_v43, -inf }
 0xa9c   :  { %v2805_v28 = vadd.f32 %v2191_v7, %v1321_v4  ;;  %v1357_v31 = vsel %vm411_vm3, %v1319_v52, -inf  ;;  %v1333_v39 = vsel %vm386_vm4, %v1319_v52, -inf }
 0xa9d   :  { %1358 = vmax.xlane.f32.xlu0 %v1357_v31  ;;  %v1366_v20 = vsel %vm411_vm3, %v1330_v32, -inf  ;;  %v1342_v2 = vsel %vm386_vm4, %v1330_v32, -inf }
 0xa9e   :  { %v1360_v55 = vsel %vm411_vm3, %v2805_v28, -inf  ;;  %v1336_v58 = vsel %vm386_vm4, %v2805_v28, -inf }
 0xa9f   :  { %1361 = vmax.xlane.f32.xlu1 %v1360_v55 }
 0xaa1   :  { %1364 = vmax.xlane.f32.xlu0 %v1363_v37 }
 0xaa3   :  { %1334 = vmax.xlane.f32.xlu1 %v1333_v39  ;;  %v891_v39 = vmul.f32 %v2680_v56, %v2680_v56 }
 0xaa5   :  { %1367 = vmax.xlane.f32.xlu0 %v1366_v20  ;;  %v890_v20 = vmul.f32 %v2676_v45, %v2676_v45 }
 0xaa7   :  { %1340 = vmax.xlane.f32.xlu1 %v1339_v46  ;;  %v1200_v46 = vmul.f32 %v2790_v18, %v2790_v18 }
 0xaa9   :  { %1343 = vmax.xlane.f32.xlu0 %v1342_v2  ;;  %v897_v2 = vsel %vm318_vm2, %v891_v39, 0.0 }
 0xaad   :  { %1337 = vmax.xlane.f32.xlu0 %v1336_v58  ;;  %v894_v58 = vsel %vm318_vm2, %v890_v20, 0.0 }
 0xb2a   :  { %v1359_v44 = vpop.xlane.xlu0 %1358 }
 0xb2b   :  { %v1369_v9 = vsub.f32 %v1319_v52, %v1359_v44  ;;  %v893_v44 = vmul.f32 %v2678_v6, %v2678_v6 }
 0xb2c   :  { %v1362_v13 = vpop.xlane.xlu1 %1361 }
 0xb2d   :  { %v1373_v47 = vmul.f32 1.442695, %v1369_v9  ;;  %v1370_v49 = vsub.f32 %v2805_v28, %v1362_v13 }
 0xb2e   :  { %v1365_v60 = vpop.xlane.xlu0 %1364 }
 0xb2f   :  { %2125 = vpow2.f32 %v1373_v47  ;;  %v1375_v63 = vmul.f32 1.442695, %v1370_v49  ;;  %v1371_v34 = vsub.f32 %v1327_v43, %v1365_v60  ;;  %v1201_v49 = vmul.f32 %v2794_v24, %v2794_v24 }
 0xb30   :  { %v1335_v19 = vpop.xlane.xlu1 %1334  ;;  %v903_v60 = vsel %vm318_vm2, %v893_v44, 0.0 }
 0xb31   :  { %2127 = vpow2.f32 %v1375_v63  ;;  %v1377_v35 = vmul.f32 1.442695, %v1371_v34  ;;  %v1345_v21 = vsub.f32 %v1319_v52, %v1335_v19  ;;  %v1203_v34 = vmul.f32 %v2792_v23, %v2792_v23 }
 0xb32   :  { %v1368_v3 = vpop.xlane.xlu0 %1367 }
 0xb33   :  { %2129 = vpow2.f32 %v1377_v35  ;;  %v1372_v0 = vsub.f32 %v1330_v32, %v1368_v3  ;;  %v1349_v11 = vmul.f32 1.442695, %v1345_v21  ;;  %v1207_v35 = vsel %vm318_vm2, %v1201_v49, 0.0 }
 0xb34   :  { %v1341_v41 = vpop.xlane.xlu1 %1340  ;;  %v1213_v3 = vsel %vm318_vm2, %v1203_v34, 0.0 }
 0xb35   :  { %v1379_v12 = vmul.f32 1.442695, %v1372_v0  ;;  %v1347_v42 = vsub.f32 %v1327_v43, %v1341_v41 }
 0xb36   :  { %v1344_v48 = vpop.xlane.xlu0 %1343 }
 0xb37   :  { %2131 = vpow2.f32 %v1379_v12  ;;  %v1348_v27 = vsub.f32 %v1330_v32, %v1344_v48  ;;  %v1353_v61 = vmul.f32 1.442695, %v1347_v42 }
 0xb38   :  { %2133 = vpow2.f32 %v1349_v11 }
 0xb39   :  { %v2821_v10 = vpop.eup %2125  ;;  %v1355_v29 = vmul.f32 1.442695, %v1348_v27 }
 0xb3a   :  { %1405 = vrot.lane.b32.xlu1 %v2821_v10, %s2274_s6  ;;  %v1338_v52 = vpop.xlane.xlu0 %1337 }
 0xb3b   :  { %v2825_v8 = vpop.eup %2127  ;;  %2135 = vpow2.f32 %v1355_v29  ;;  %v1346_v26 = vsub.f32 %v2805_v28, %v1338_v52 }
 0xb3c   :  { %1407 = vrot.lane.b32.xlu0 %v2825_v8, %s2274_s6  ;;  %2137 = vpow2.f32 %v1353_v61 }
 0xb3d   :  { %v2829_v14 = vpop.eup %2129  ;;  %v1351_v4 = vmul.f32 1.442695, %v1346_v26 }
 0xb3e   :  { %1409 = vrot.lane.b32.xlu1 %v2829_v14, %s2274_s6 }
 0xb3f   :  { %2139 = vpow2.f32 %v1351_v4 }
 0xb41   :  { %v2833_v30 = vpop.eup %2131 }
 0xb42   :  { %1411 = vrot.lane.b32.xlu1 %v2833_v30, %s2274_s6  ;;  %v2837_v15 = vpop.eup %2133 }
 0xb43   :  { %v1381_v1 = vsel %vm386_vm4, %v2837_v15, 0.0 }
 0xb45   :  { %v2841_v16 = vpop.eup %2135 }
 0xb46   :  { %v1390_v25 = vsel %vm386_vm4, %v2841_v16, 0.0  ;;  %v2845_v50 = vpop.eup %2137 }
 0xb47   :  { %v1387_v5 = vsel %vm386_vm4, %v2845_v50, 0.0 }
 0xb49   :  { %v2852_v33 = vpop.eup %2139 }
 0xb4a   :  { %v1384_v43 = vsel %vm386_vm4, %v2852_v33, 0.0 }
 0xb5b   :  { %1382 = vadd.xlane.f32.xlu0 %v1381_v1 }
 0xb5f   :  { %1391 = vadd.xlane.f32.xlu0 %v1390_v25 }
 0xb66   :  { %1388 = vadd.xlane.f32.xlu1 %v1387_v5 }
 0xb77   :  { %1443 = vrot.lane.b32.xlu1 %v2455_v40, %s2275_s7 }
 0xb9b   :  { %1385 = vadd.xlane.f32.xlu1 %v1384_v43 }
 0xbac   :  { %v1406_v7 = vpop.permute.xlu1 %1405 }
 0xbad   :  { %v1417_v31 = vsel %vm386_vm4, %v1406_v7, 0.0 }
 0xbae   :  { %1418 = vadd.xlane.f32.xlu0 %v1417_v31  ;;  %v1408_v28 = vpop.permute.xlu0 %1407 }
 0xbaf   :  { %v1420_v37 = vsel %vm386_vm4, %v1408_v28, 0.0 }
 0xbb0   :  { %v1410_v55 = vpop.permute.xlu1 %1409 }
 0xbb1   :  { %v1423_v38 = vsel %vm386_vm4, %v1410_v55, 0.0 }
 0xbb2   :  { %1424 = vadd.xlane.f32.xlu1 %v1423_v38 }
 0xbb4   :  { %v1412_v40 = vpop.permute.xlu1 %1411 }
 0xbb5   :  { %v1426_v32 = vsel %vm386_vm4, %v1412_v40, 0.0 }
 0xbb6   :  { %1427 = vadd.xlane.f32.xlu0 %v1426_v32 }
 0xbba   :  { %1421 = vadd.xlane.f32.xlu0 %v1420_v37 }
 0xbc3   :  { %1447 = vrot.lane.b32.xlu1 %v2528_v62, %s2275_s7  ;;  %v892_v62 = vmul.f32 %v2674_v57, %v2674_v57 }
 0xbc5   :  { %v900_v13 = vsel %vm318_vm2, %v892_v62, 0.0 }
 0xbc7   :  { %1449 = vrot.lane.b32.xlu1 %v2532_v22, %s2275_s7  ;;  %v1202_v22 = vmul.f32 %v2788_v17, %v2788_v17 }
 0xbc9   :  { %v1210_v9 = vsel %vm318_vm2, %v1202_v22, 0.0 }
 0xbd0   :  { %1445 = vrot.lane.b32.xlu0 %v2453_v36, %s2275_s7  ;;  %v1204_v36 = vsel %vm318_vm2, %v1200_v46, 0.0 }
 0xbe8   :  { %v1383_v0 = vpop.xlane.xlu0 %1382 }
 0xbe9   :  { %2141 = vrcp.f32 %v1383_v0 }
 0xbeb   :  { %898 = vadd.xlane.f32.xlu1 %v897_v2 }
 0xbec   :  { %v1392_v12 = vpop.xlane.xlu0 %1391 }
 0xbed   :  { %2143 = vrcp.f32 %v1392_v12 }
 0xbef   :  { %1205 = vadd.xlane.f32.xlu1 %v1204_v36  ;;  %895 = vadd.xlane.f32.xlu0 %v894_v58 }
 0xbf3   :  { %1211 = vadd.xlane.f32.xlu1 %v1210_v9  ;;  %901 = vadd.xlane.f32.xlu0 %v900_v13  ;;  %v1389_v47 = vpop.xlane.xlu1 %1388  ;;  %v2142_v41 = vpop.eup %2141 }
 0xbf4   :  { %v1397_v40 = vmul.f32 %v2142_v41, %v2837_v15 }
 0xbf7   :  { %904 = vadd.xlane.f32.xlu0 %v903_v60  ;;  %v1444_v63 = vpop.permute.xlu1 %1443  ;;  %v2144_v61 = vpop.eup %2143 }
 0xbf8   :  { %1911 = vmatprep.subr.bf16.mxu0 %v1444_v63  ;;  %v1400_v55 = vmul.f32 %v2144_v61, %v2841_v16 }
 0xbf9   :  { %1912 = vmatpush3.bf16.msra.mxu0 %v1444_v63 }
 0xbfb   :  { %1208 = vadd.xlane.f32.xlu0 %v1207_v35 }
 0xbff   :  { %1214 = vadd.xlane.f32.xlu0 %v1213_v3 }
 0xc28   :  { %v1386_v19 = vpop.xlane.xlu1 %1385 }
 0xc3b   :  { %v1419_v21 = vpop.xlane.xlu0 %1418 }
 0xc3c   :  { %2145 = vrcp.f32 %v1419_v21 }
 0xc3f   :  { %v1425_v48 = vpop.xlane.xlu1 %1424 }
 0xc43   :  { %v1428_v11 = vpop.xlane.xlu0 %1427  ;;  %v1448_v29 = vpop.permute.xlu1 %1447 }
 0xc44   :  { %2147 = vrcp.f32 %v1428_v11 }
 0xc45   :  { %2149 = vrcp.f32 %v1425_v48 }
 0xc46   :  { %2151 = vrcp.f32 %v1386_v19  ;;  %v2146_v1 = vpop.eup %2145 }
 0xc47   :  { %2153 = vrcp.f32 %v1389_v47  ;;  %v1422_v27 = vpop.xlane.xlu0 %1421  ;;  %v1433_v43 = vmul.f32 %v2146_v1, %v2821_v10  ;;  %v1450_v7 = vpop.permute.xlu1 %1449 }
 0xc48   :  { %2155 = vrcp.f32 %v1422_v27 }
 0xc49   :  { %v1437_v10 = vsel %vm386_vm4, %v1397_v40, %v1433_v43 }
 0xc4b   :  { %v1446_v42 = vpop.permute.xlu0 %1445 }
 0xc4c   :  { %1913 = vmatprep.subr.bf16.mxu0 %v1446_v42 }
 0xc4d   :  { %1914 = vmatpush3.bf16.msra.mxu0 %v1446_v42 }
 0xc4e   :  { %v2148_v25 = vpop.eup %2147  ;;  %1915 = vmatprep.subr.bf16.mxu0 %v1448_v29 }
 0xc4f   :  { %v2150_v5 = vpop.eup %2149  ;;  %v1436_v26 = vmul.f32 %v2148_v25, %v2833_v30 }
 0xc50   :  { %v2152_v52 = vpop.eup %2151  ;;  %v1435_v38 = vmul.f32 %v2150_v5, %v2829_v14 }
 0xc51   :  { %v2154_v4 = vpop.eup %2153  ;;  %1916 = vmatpush3.bf16.msra.mxu0 %v1448_v29  ;;  %v1398_v32 = vmul.f32 %v2152_v52, %v2852_v33  ;;  %v1440_v30 = vsel %vm386_vm4, %v1400_v55, %v1436_v26 }
 0xc52   :  { %v2156_v31 = vpop.eup %2155  ;;  %1917 = vmatprep.subr.bf16.mxu0 %v1450_v7  ;;  %v1399_v37 = vmul.f32 %v2154_v4, %v2845_v50 }
 0xc53   :  { %v1434_v28 = vmul.f32 %v2156_v31, %v2825_v8 }
 0xc54   :  { %v1439_v16 = vsel %vm386_vm4, %v1399_v37, %v1435_v38 }
 0xc55   :  { %1918 = vmatpush3.bf16.msra.mxu0 %v1450_v7  ;;  %v1438_v39 = vsel %vm386_vm4, %v1398_v32, %v1434_v28  ;;  %v1442_v14 = vpack.c.bf16 %v1440_v30, %v1439_v16  ;;  %v573_v30 = vmul.f32 %v2562_v53, %v2562_v53  ;;  %v575_v16 = vmul.f32 %v2560_v51, %v2560_v51 }
 0xc56   :  { %v1441_v20 = vpack.c.bf16 %v1438_v39, %v1437_v10  ;;  %v574_v39 = vmul.f32 %v2566_v59, %v2566_v59 }
 0xc58   :  { %1919 = vmatprep.mubr.msk.bf16.mxu0 %vm144_vm1, %v1441_v20 }
 0xc59   :  { %1920 = vmatmul.mubr.msk.bf16.vlgmr.msra.gmra.mrb[20].mxu0 %vm144_vm1, %v1442_v14  ;;  %v577_v14 = vsel %vm318_vm2, %v573_v30, 0.0 }
 0xc78   :  { %v899_v15 = vpop.xlane.xlu1 %898 }
 0xc79   :  { %v907_v33 = vmul.f32 0.0625, %v899_v15  ;;  %v576_v15 = vmul.f32 %v2564_v54, %v2564_v54 }
 0xc7b   :  { %v911_v8 = vadd.f32 1e-05, %v907_v33  ;;  %v580_v33 = vsel %vm318_vm2, %v574_v39, 0.0 }
 0xc7c   :  { %v896_v46 = vpop.xlane.xlu0 %895  ;;  %v1206_v2 = vpop.xlane.xlu1 %1205 }
 0xc7d   :  { %v906_v50 = vmul.f32 0.0625, %v896_v46  ;;  %2157 = vrsqrt.f32 %v911_v8  ;;  %v1216_v58 = vmul.f32 0.0625, %v1206_v2  ;;  %v583_v8 = vsel %vm318_vm2, %v575_v16, 0.0  ;;  %v2026_v2 = vld [vmem:[%s2997_s4 + $0x8] sm:$0xff]  }
 0xc7e   :  { %v586_v46 = vsel %vm318_vm2, %v576_v15, 0.0 }
 0xc7f   :  { %v910_v62 = vadd.f32 1e-05, %v906_v50  ;;  %v1220_v49 = vadd.f32 1e-05, %v1216_v58  ;;  %v2025_v50 = vld [vmem:[%s2997_s4] sm:$0xff]  }
 0xc80   :  { %v902_v22 = vpop.xlane.xlu0 %901  ;;  %v1212_v9 = vpop.xlane.xlu1 %1211  ;;  %1923 = vmatprep.subr.bf16.mxu0 %v2025_v50 }
 0xc81   :  { %2159 = vrsqrt.f32 %v910_v62  ;;  %v908_v36 = vmul.f32 0.0625, %v902_v22  ;;  %v1218_v60 = vmul.f32 0.0625, %v1212_v9  ;;  %1924 = vmatpush3.bf16.msra.mxu0 %v2025_v50 }
 0xc82   :  { %1925 = vmatprep.subr.bf16.mxu0 %v2026_v2 }
 0xc83   :  { %v912_v44 = vadd.f32 1e-05, %v908_v36  ;;  %v1222_v12 = vadd.f32 1e-05, %v1218_v60 }
 0xc84   :  { %v905_v13 = vpop.xlane.xlu0 %904 }
 0xc85   :  { %v909_v47 = vmul.f32 0.0625, %v905_v13  ;;  %2161 = vrsqrt.f32 %v912_v44  ;;  %1926 = vmatpush3.bf16.msra.mxu0 %v2026_v2 }
 0xc87   :  { %v913_v63 = vadd.f32 1e-05, %v909_v47  ;;  %v2158_v35 = vpop.eup %2157 }
 0xc88   :  { %v1209_v34 = vpop.xlane.xlu0 %1208  ;;  %v919_v11 = vmul.f32 %v2158_v35, %v2680_v56  ;;  %v2027_v35 = vld [vmem:[%s2997_s4 + $0x10] sm:$0xff]  }
 0xc89   :  { %2163 = vrsqrt.f32 %v913_v63  ;;  %v1217_v3 = vmul.f32 0.0625, %v1209_v34  ;;  %1927 = vmatprep.subr.bf16.mxu0 %v2027_v35 }
 0xc8a   :  { %2165 = vrsqrt.f32 %v1220_v49  ;;  %1928 = vmatpush3.bf16.msra.mxu0 %v2027_v35 }
 0xc8b   :  { %v2160_v0 = vpop.eup %2159  ;;  %v1221_v19 = vadd.f32 1e-05, %v1217_v3  ;;  %v2028_v3 = vld [vmem:[%s2997_s4 + $0x18] sm:$0xff]   ;;  %s2280_s4 = smov [#allocation7]  }
 0xc8c   :  { %v1215_v21 = vpop.xlane.xlu0 %1214  ;;  %v918_v48 = vmul.f32 %v2160_v0, %v2676_v45  ;;  %1929 = vmatprep.subr.bf16.mxu0 %v2028_v3  ;;  %s1701_s26 = sshll.u32 %s2280_s4, 4  ;;  %s1702_s26 = int_to_ptr.vmem [resolvable:$true] %s1701_s26 }
 0xc8d   :  { %2167 = vrsqrt.f32 %v1221_v19  ;;  %v1219_v27 = vmul.f32 0.0625, %v1215_v21  ;;  %s2237_s27 = scalar_lea.vmem %s1702_s26, 512  ;;  %p2242_p3 = scmp.lt.s32.totalorder %s1702_s26, %s1702_s26 }
 0xc8e   :  { %v1977_v41 = vpack.i.bf16 %v919_v11, %v918_v48  ;;  %2169 = vrsqrt.f32 %v1222_v12  ;;  %1930 = vmatpush3.bf16.msra.mxu0 %v2028_v3  ;;  %p2238_p2 = scmp.ne.s32.totalorder %s1702_s26, %s2237_s27  ;;  %p2243_p4 = scmp.lt.s32.totalorder %s2237_s27, %s2237_s27 }
 0xc8f   :  { %v1223_v29 = vadd.f32 1e-05, %v1219_v27  ;;  %v2162_v42 = vpop.eup %2161 }
 0xc90   :  { %v920_v1 = vmul.f32 %v2162_v42, %v2674_v57  ;;  %p2244_p5 = por %p2243_p4, %p2242_p3 }
 0xc91   :  { %2171 = vrsqrt.f32 %v1223_v29 }
 0xc92   :  { %p2245_p6 = pnand %p2244_p5, %p2238_p2 }
 0xc93   :  { %v2164_v61 = vpop.eup %2163 }
 0xc94   :  { %v921_v25 = vmul.f32 %v2164_v61, %v2678_v6  ;;  %v2166_v5 = vpop.eup %2165 }
 0xc95   :  { %v1228_v4 = vmul.f32 %v2166_v5, %v2790_v18 }
 0xc96   :  { %v1982_v52 = vpack.i.bf16 %v921_v25, %v920_v1 }
 0xc97   :  { %v2168_v26 = vpop.eup %2167 }
 0xc98   :  { %v1229_v45 = vmul.f32 %v2168_v26, %v2794_v24  ;;  %v2170_v56 = vpop.eup %2169 }
 0xc99   :  { %v1230_v31 = vmul.f32 %v2170_v56, %v2788_v17 }
 0xc9a   :  { %v1987_v43 = vpack.i.bf16 %v1229_v45, %v1228_v4 }
 0xc9b   :  { %v2172_v7 = vpop.eup %2171 }
 0xc9c   :  { %v1231_v55 = vmul.f32 %v2172_v7, %v2792_v23 }
 0xc9e   :  { %v1992_v38 = vpack.i.bf16 %v1231_v55, %v1230_v31 }
 0xd2c   :  { %v2912_v40 = vpop.f32.mrb[20].mxu0 }
 0xd2d   :  { %v1495_v57 = vpop.f32.mrb[21].mxu0  ;;  %v1512_v18 = vmul.f32 %v2912_v40, %v2912_v40 }
 0xd2e   :  { %v1510_v32 = vmul.f32 %v1495_v57, %v1495_v57  ;;  %v2914_v6 = vpop.f32.mrb[22].mxu0 }
 0xd2f   :  { %v1498_v28 = vpop.f32.mrb[23].mxu0  ;;  %v1513_v17 = vmul.f32 %v2914_v6, %v2914_v6  ;;  %v1520_v10 = vsel %vm318_vm2, %v1512_v18, 0.0 }
 0xd30   :  { %v1511_v37 = vmul.f32 %v1498_v28, %v1498_v28  ;;  %v1514_v24 = vsel %vm318_vm2, %v1510_v32, 0.0 }
 0xd31   :  { %1515 = vadd.xlane.f32.xlu1 %v1514_v24  ;;  %v1523_v20 = vsel %vm318_vm2, %v1513_v17, 0.0 }
 0xd32   :  { %v1517_v23 = vsel %vm318_vm2, %v1511_v37, 0.0 }
 0xd33   :  { %1518 = vadd.xlane.f32.xlu0 %v1517_v23 }
 0xd35   :  { %1521 = vadd.xlane.f32.xlu1 %v1520_v10 }
 0xd37   :  { %1524 = vadd.xlane.f32.xlu0 %v1523_v20 }
 0xd39   :  { %578 = vadd.xlane.f32.xlu1 %v577_v14 }
 0xd3b   :  { %581 = vadd.xlane.f32.xlu0 %v580_v33 }
 0xd3d   :  { %584 = vadd.xlane.f32.xlu1 %v583_v8 }
 0xd3f   :  { %587 = vadd.xlane.f32.xlu0 %v586_v46 }
 0xd4e   :  { %1978 = vrot.lane.b32.xlu1 %v1977_v41, %s2279_s11 }
 0xd52   :  { %1988 = vrot.lane.b32.xlu1 %v1987_v43, %s2278_s10 }
 0xd55   :  { %1983 = vrot.lane.b32.xlu0 %v1982_v52, %s2279_s11 }
 0xd56   :  { %1993 = vrot.lane.b32.xlu1 %v1992_v38, %s2278_s10 }
 0xdbe   :  { %v1516_v62 = vpop.xlane.xlu1 %1515 }
 0xdbf   :  { %v1526_v22 = vmul.f32 0.0625, %v1516_v62 }
 0xdc0   :  { %v1519_v36 = vpop.xlane.xlu0 %1518 }
 0xdc1   :  { %v1530_v58 = vadd.f32 1e-05, %v1526_v22  ;;  %v1527_v44 = vmul.f32 0.0625, %v1519_v36 }
 0xdc2   :  { %v1522_v9 = vpop.xlane.xlu1 %1521 }
 0xdc3   :  { %2173 = vrsqrt.f32 %v1530_v58  ;;  %v1531_v13 = vadd.f32 1e-05, %v1527_v44  ;;  %v1528_v47 = vmul.f32 0.0625, %v1522_v9 }
 0xdc4   :  { %v1525_v49 = vpop.xlane.xlu0 %1524 }
 0xdc5   :  { %2175 = vrsqrt.f32 %v1531_v13  ;;  %v1532_v60 = vadd.f32 1e-05, %v1528_v47  ;;  %v1529_v63 = vmul.f32 0.0625, %v1525_v49 }
 0xdc6   :  { %v579_v61 = vpop.xlane.xlu1 %578 }
 0xdc7   :  { %2177 = vrsqrt.f32 %v1532_v60  ;;  %v1533_v34 = vadd.f32 1e-05, %v1529_v63  ;;  %v590_v25 = vmul.f32 0.0625, %v579_v61 }
 0xdc8   :  { %v582_v1 = vpop.xlane.xlu0 %581 }
 0xdc9   :  { %2179 = vrsqrt.f32 %v1533_v34  ;;  %v591_v5 = vmul.f32 0.0625, %v582_v1  ;;  %v594_v4 = vadd.f32 1e-05, %v590_v25 }
 0xdca   :  { %v585_v52 = vpop.xlane.xlu1 %584 }
 0xdcb   :  { %v592_v45 = vmul.f32 0.0625, %v585_v52  ;;  %v595_v56 = vadd.f32 1e-05, %v591_v5  ;;  %2181 = vrsqrt.f32 %v594_v4 }
 0xdcc   :  { %v588_v26 = vpop.xlane.xlu0 %587 }
 0xdcd   :  { %v2174_v0 = vpop.eup %2173  ;;  %v593_v43 = vmul.f32 0.0625, %v588_v26  ;;  %v596_v7 = vadd.f32 1e-05, %v592_v45  ;;  %2183 = vrsqrt.f32 %v595_v56 }
 0xdce   :  { %v1538_v19 = vmul.f32 %v2174_v0, %v1495_v57  ;;  %v1979_v55 = vpop.permute.xlu1 %1978 }
 0xdcf   :  { %v2176_v12 = vpop.eup %2175  ;;  %v597_v31 = vadd.f32 1e-05, %v593_v43  ;;  %2185 = vrsqrt.f32 %v596_v7  ;;  %v1981_v24 = vunpack.i.h.bf16 %v1979_v55  ;;  %v1980_v17 = vunpack.i.l.bf16 %v1979_v55 }
 0xdd0   :  { %v1539_v21 = vmul.f32 %v2176_v12, %v1498_v28  ;;  %v1984_v37 = vpop.permute.xlu0 %1983 }
 0xdd1   :  { %v2178_v48 = vpop.eup %2177  ;;  %2187 = vrsqrt.f32 %v597_v31  ;;  %v1985_v33 = vunpack.i.l.bf16 %v1984_v37 }
 0xdd2   :  { %v1997_v11 = vpack.i.bf16 %v1539_v21, %v1538_v19  ;;  %v1540_v41 = vmul.f32 %v2178_v48, %v2912_v40  ;;  %v1989_v57 = vpop.permute.xlu1 %1988 }
 0xdd3   :  { %v2180_v27 = vpop.eup %2179  ;;  %v1991_v20 = vunpack.i.h.bf16 %v1989_v57  ;;  %v1990_v16 = vunpack.i.l.bf16 %v1989_v57 }
 0xdd4   :  { %1998 = vrot.lane.b32.xlu0 %v1997_v11, %s2276_s8  ;;  %v1541_v29 = vmul.f32 %v2180_v27, %v2914_v6 }
 0xdd5   :  { %v2182_v38 = vpop.eup %2181 }
 0xdd6   :  { %v2002_v42 = vpack.i.bf16 %v1541_v29, %v1540_v41  ;;  %v602_v6 = vmul.f32 %v2182_v38, %v2562_v53  ;;  %v1994_v14 = vpop.permute.xlu1 %1993  ;;  %v1986_v53 = vunpack.i.h.bf16 %v1984_v37 }
 0xdd7   :  { %v2184_v40 = vpop.eup %2183  ;;  %v1996_v22 = vunpack.i.h.bf16 %v1994_v14  ;;  %v1995_v36 = vunpack.i.l.bf16 %v1994_v14 }
 0xdd8   :  { %2003 = vrot.lane.b32.xlu1 %v2002_v42, %s2276_s8  ;;  %v603_v28 = vmul.f32 %v2184_v40, %v2566_v59  ;;  %v1590_v23 = vsel %vm318_vm2, %v602_v6, %v1980_v17 }
 0xdd9   :  { %v2186_v32 = vpop.eup %2185  ;;  %v1594_v46 = vsel %vm386_vm4, %v1590_v23, %v1990_v16 }
 0xdda   :  { %v1591_v30 = vsel %vm318_vm2, %v603_v28, %v1981_v24  ;;  %v604_v10 = vmul.f32 %v2186_v32, %v2560_v51 }
 0xddb   :  { %v2188_v18 = vpop.eup %2187  ;;  %v1595_v50 = vsel %vm386_vm4, %v1591_v30, %v1991_v20 }
 0xddc   :  { %v605_v39 = vmul.f32 %v2188_v18, %v2564_v54  ;;  %v1592_v62 = vsel %vm318_vm2, %v604_v10, %v1985_v33 }
 0xddd   :  { %v1596_v47 = vsel %vm386_vm4, %v1592_v62, %v1995_v36 }
 0xdde   :  { %v1593_v2 = vsel %vm318_vm2, %v605_v39, %v1986_v53 }
 0xddf   :  { %v1597_v49 = vsel %vm386_vm4, %v1593_v2, %v1996_v22 }
 0xe46   :  { %v1999_v15 = vpop.permute.xlu0 %1998 }
 0xe47   :  { %v2001_v59 = vunpack.i.h.bf16 %v1999_v15  ;;  %v2000_v8 = vunpack.i.l.bf16 %v1999_v15 }
 0xe49   :  { %v1600_v51 = vsel %vm1598_vm5, %v1595_v50, %v2001_v59  ;;  %v1599_v54 = vsel %vm1598_vm5, %v1594_v46, %v2000_v8 }
 0xe4a   :  { %v1603_v58 = vpack.c.bf16 %v1600_v51, %v1599_v54  ;;  %v2004_v44 = vpop.permute.xlu1 %2003 }
 0xe4b   :  { %v2006_v9 = vunpack.i.h.bf16 %v2004_v44  ;;  %v2005_v13 = vunpack.i.l.bf16 %v2004_v44 }
 0xe4c   :  { %1931 = vmatprep.mubr.msk.bf16.mxu0 %vm144_vm1, %v1603_v58 }
 0xe4d   :  { %v1601_v60 = vsel %vm1598_vm5, %v1596_v47, %v2005_v13  ;;  %v1602_v63 = vsel %vm1598_vm5, %v1597_v49, %v2006_v9 }
 0xe4e   :  { %v1604_v34 = vpack.c.bf16 %v1602_v63, %v1601_v60 }
 0xe50   :  { %1932 = vmatmul.mubr.msk.bf16.vlgmr.msra.gmra.mrb[24].mxu0 %vm144_vm1, %v1604_v34 }
 0xf23   :  { %v1933_v35 = vpop.f32.mrb[24].mxu0 }
 0xf24   :  { %1694 = vst.msk [vmem:[#allocation7 + $0x10] sm:$0xff] %vm144_vm1, %v1933_v35  ;;  %v1677_v3 = vpop.f32.mrb[25].mxu0 }
 0xf25   :  { %1692 = vst.msk [vmem:[#allocation7] sm:$0xff] %vm144_vm1, %v1677_v3  ;;  %v1934_v0 = vpop.f32.mrb[26].mxu0 }
 0xf26   :  { %1695 = vst.msk [vmem:[#allocation7 + $0x18] sm:$0xff] %vm144_vm1, %v1934_v0  ;;  %v1680_v12 = vpop.f32.mrb[27].mxu0 }
 0xf27   :  { %1693 = vst.msk [vmem:[#allocation7 + $0x8] sm:$0xff] %vm144_vm1, %v1680_v12 }
 0xf28   :  { %2248 = shalt.err (!%p2245_p6)
}
 0xf29   :  { %s2249_s30 = scalar_lea.hbm %s2998_s5, 512 }
 0xf2a   :  { %p2250_p7 = scmp.ne.s32.totalorder %s2998_s5, %s2249_s30  ;;  %p2253_p8 = scmp.lt.u32.totalorder %s2249_s30, %s2998_s5 }
 0xf2c   :  { %p2255_p9 = pnand %p2253_p8, %p2250_p7 }
 0xf2e   :  { %2258 = shalt.err (!%p2255_p9)
}
 0xf2f   :  { %1707 = dma.vmem_to_hbm [thread:$0]  %s1702_s26, 512, %s2998_s5, [#allocation4], %s2269_s1, %s2269_s1, %s2270_s17  }
 0xf30   :  { %2263 = dma.done.wait [#allocation4], 512  }
 0xf31   :  { %2264 = vsyncadd [#allocation4], 4294966784 }
 0xf32   :  { %1711 = vsyncpa [#allocation3], 1 }
 0xf33   :  { %1712 = vsyncpa [#allocation6], 1 }
 0xf34   :  { %1713 = vsyncpa [#allocation4], 1 }

</bundles_post_ra>
